<compile_context>
chip_gen: v6e
topology: v6e:2x2x1
jax: 0.10.0
libtpu: 0.0.40
codegen_flags: <defaults>
</compile_context>

<pallas_src>
import numpy as np

import jax
import jax.numpy as jnp
from jax.experimental import pallas as pl
from jax.experimental.pallas import tpu as pltpu

EPS = 1e-5
NEG_SLOPE = 0.01


# ---------------------------------------------------------------------------
# Small helpers
# ---------------------------------------------------------------------------
def _vmem_limit_bytes():
    # Scoped-VMEM limit derived from the actual chip, with ~25% headroom.
    cap = 64 * 1024 * 1024          # conservative fallback (v7x physical VMEM)
    try:
        info = pltpu.get_tpu_info()
        cap = int(getattr(info, "vmem_capacity_bytes", cap))
    except Exception:
        pass
    return max(32 * 1024 * 1024, min(int(cap * 0.75), 100 * 1024 * 1024))


def _round_up(x, m):
    return ((x + m - 1) // m) * m


def _padded_plane_bytes(rows, cols, itemsize):
    # VMEM footprint of a (rows, cols) tile: lanes pad to 128, sublanes to the
    # packing of the dtype (8 rows for 32-bit, 16 for 16-bit, 32 for 8-bit).
    sub = max(8, 32 // max(itemsize, 1))
    return _round_up(rows, sub) * _round_up(max(cols, 1), 128) * itemsize


def _divisors(n):
    return [d for d in range(1, n + 1) if n % d == 0]


def _pick_tiles(N, C1, Ds, Hs, Ws, itemsize, budget_bytes, max_td=32):
    """VMEM-aware (channel-tile, depth-tile) for the fx/out stream of kernel 2."""
    plane = _padded_plane_bytes(Hs, Ws, itemsize)
    tc_cands = _divisors(C1)
    if N == 1 and C1 > 1:
        # Keep >= 2 parallel grid steps so both v7x TensorCores stay busy when
        # batch == 1 (the t axis is serial because it carries the gate scratch).
        tc_cands = [tc for tc in tc_cands if C1 // tc >= 2]
    td_cands = [td for td in _divisors(Ds) if td <= max_td]
    best, best_key = (tc_cands[0], td_cands[0]), (-1, -1)
    for tc in tc_cands:
        for td in td_cands:
            # fx in + out, both double-buffered.
            if 4 * tc * td * plane <= budget_bytes:
                key = (tc * td, td)        # maximize bytes, prefer deeper tiles
                if key > best_key:
                    best, best_key = (tc, td), key
    return best


# Host-side (numpy) trilinear coordinates, align_corners=False (PyTorch).
def _axis_src_np(in_sz, out_sz):
    scale = in_sz / out_sz
    c = (np.arange(out_sz, dtype=np.float64) + 0.5) * scale - 0.5
    c = np.clip(c, 0.0, in_sz - 1)
    i0 = np.clip(np.floor(c).astype(np.int64), 0, in_sz - 1).astype(np.int32)
    i1 = np.minimum(i0 + 1, in_sz - 1).astype(np.int32)
    w1 = (c - i0).astype(np.float32)
    w0 = (1.0 - w1).astype(np.float32)
    return i0, i1, w0, w1


def _interp_matrix_np(in_sz, out_sz):
    i0, i1, w0, w1 = _axis_src_np(in_sz, out_sz)
    m = np.zeros((out_sz, in_sz), np.float32)
    m[np.arange(out_sz), i0] += w0
    m[np.arange(out_sz), i1] += w1
    return m


def _inorm(x):
    # InstanceNorm over the spatial (lane) axis, per channel row.  Matches
    # nn.InstanceNorm3d(affine=False, eps=1e-5) (biased variance).
    mean = jnp.mean(x, axis=-1, keepdims=True)
    var = jnp.mean(jnp.square(x - mean), axis=-1, keepdims=True)
    return (x - mean) * jax.lax.rsqrt(var + EPS)


def _leaky_relu(x):
    return jnp.where(x >= 0, x, NEG_SLOPE * x)


# ---------------------------------------------------------------------------
# Kernel 1: attention-gate core at coarse resolution (channels on sublanes,
# flattened voxels on lanes).
# ---------------------------------------------------------------------------
def _gate_kernel(g_ref, s_ref, wg_ref, wf_ref, wo_ref, att_ref):
    g = g_ref[0].astype(jnp.float32)                               # (C0, Sg)
    s = s_ref[0].astype(jnp.float32)                               # (C1, Sg)
    wg = wg_ref[...].astype(jnp.float32)
    wf = wf_ref[...].astype(jnp.float32)
    wo = wo_ref[...].astype(jnp.float32)

    a = _inorm(jnp.dot(wg, g, preferred_element_type=jnp.float32))
    a = a + _inorm(jnp.dot(wf, s, preferred_element_type=jnp.float32))
    r = _leaky_relu(a)                                             # (F, Sg)
    # F -> 1 conv on the VPU: broadcast multiply + small sublane reduction.
    o = jnp.sum(r * wo, axis=0, keepdims=True)                     # (1, Sg)
    att_ref[0] = jax.nn.sigmoid(_inorm(o))


def _gate_coarse(g2, s2, wg, wf, wo, vmem_limit):
    # TODO(synk): for very large coarse grids (channels*Sg beyond VMEM) this
    # whole-instance block needs Sg-tiling with a two-pass InstanceNorm.
    N, C0, Sg = g2.shape
    C1 = s2.shape[1]
    Fch = wg.shape[0]
    return pl.pallas_call(
        _gate_kernel,
        out_shape=jax.ShapeDtypeStruct((N, 1, Sg), jnp.float32),
        grid=(N,),
        in_specs=[
            pl.BlockSpec((1, C0, Sg), lambda n: (n, 0, 0)),
            pl.BlockSpec((1, C1, Sg), lambda n: (n, 0, 0)),
            pl.BlockSpec((Fch, C0), lambda n: (0, 0)),
            pl.BlockSpec((Fch, C1), lambda n: (0, 0)),
            pl.BlockSpec((Fch, 1), lambda n: (0, 0)),
        ],
        out_specs=pl.BlockSpec((1, 1, Sg), lambda n: (n, 0, 0)),
        compiler_params=pltpu.CompilerParams(
            dimension_semantics=("parallel",),
            vmem_limit_bytes=vmem_limit),
    )(g2, s2, wg, wf, wo)


# ---------------------------------------------------------------------------
# Kernel 2: fused trilinear upsample + gating multiply.
#   - grid = (N, C1/tc, Ds/td); t ("arbitrary") carries a VMEM scratch holding
#     the H/W-upsampled gate planes for the current instance.
#   - H/W upsample: two separable matmuls, computed once per (n, c) at t == 0.
#   - Depth upsample: 2-tap gather + FMA per output plane, fused with the
#     gating multiply of the fx tile (native dtype in / out).
# ---------------------------------------------------------------------------
def _upsample_mul_kernel(d0_ref,          # SMEM (Ds,) int32  [scalar prefetch]
                         att_ref,         # (1, Dg*Hg, Wg) f32
                         mwT_ref,         # (Wg, Ws) f32
                         mh_ref,          # (Hs, Hg) f32
                         wd_ref,          # (Ds, 1) f32
                         fx_ref,          # (1, tc, td, Hs, Ws)
                         out_ref,         # (1, tc, td, Hs, Ws)
                         hw_ref):         # VMEM scratch (Dg, Hs, Ws) f32
    t = pl.program_id(2)
    Dg, Hs, Ws = hw_ref.shape
    Hg = att_ref.shape[1] // Dg
    td = fx_ref.shape[2]

    # --- once per (n, c-tile): separable H/W upsample of the coarse gate ----
    @pl.when(t == 0)
    def _():
        att = att_ref[0].astype(jnp.float32)                       # (Dg*Hg, Wg)
        xw = jnp.dot(att, mwT_ref[...],
                     preferred_element_type=jnp.float32)           # (Dg*Hg, Ws)
        mh = mh_ref[...]                                           # (Hs, Hg)
        for d in range(Dg):                                        # static unroll
            hw_ref[d] = jnp.dot(mh, xw[d * Hg:(d + 1) * Hg, :],
                                preferred_element_type=jnp.float32)

    # --- per depth tile: 2-tap depth interpolation + gating multiply --------
    for j in range(td):                                            # static unroll
        i = t * td + j                                             # abs. out depth
        dlo = d0_ref[i]
        dhi = jnp.minimum(dlo + 1, Dg - 1)
        w1 = wd_ref[pl.ds(i, 1), :]                                # (1, 1) f32
        p0 = hw_ref[pl.ds(dlo, 1)]                                 # (1, Hs, Ws)
        p1 = hw_ref[pl.ds(dhi, 1)]
        gate = (p0 * (1.0 - w1) + p1 * w1).astype(out_ref.dtype)   # (1, Hs, Ws)
        out_ref[0, :, j] = fx_ref[0, :, j] * gate


# ---------------------------------------------------------------------------
# attention_gate forward
# ---------------------------------------------------------------------------
def attention_gate_forward(params, g, fx):
    N, C0, Dg, Hg, Wg = g.shape
    _, C1, Ds, Hs, Ws = fx.shape

    # 1x1x1 conv with stride 2 on fx == stride-2 spatial subsample + matmul.
    fx_sub = fx[:, :, ::2, ::2, ::2]
    if fx_sub.shape[2:] != (Dg, Hg, Wg):
        raise ValueError("g spatial dims must match the stride-2 subsample of fx")

    vmem_limit = _vmem_limit_bytes()

    Sg = Dg * Hg * Wg
    g2 = g.reshape(N, C0, Sg)                # native dtype; cast inside kernel
    s2 = fx_sub.reshape(N, C1, Sg)

    att = _gate_coarse(g2, s2, params["wg"], params["wf"], params["wo"],
                       vmem_limit)
    att_hw = att.reshape(N, Dg * Hg, Wg)     # contiguous reshape (free)

    # Host-built (numpy) interpolation constants -> baked into the program.
    mh = jnp.asarray(_interp_matrix_np(Hg, Hs))                    # (Hs, Hg)
    mwT = jnp.asarray(_interp_matrix_np(Wg, Ws).T)                 # (Wg, Ws)
    d0_np, _, _, w1_np = _axis_src_np(Dg, Ds)
    d0 = jnp.asarray(d0_np, jnp.int32)                             # (Ds,)
    wd = jnp.asarray(w1_np.reshape(Ds, 1), jnp.float32)            # (Ds, 1)

    # VMEM-aware tile selection for the dominant fx stream.
    itemsize = jnp.dtype(fx.dtype).itemsize
    fixed = (Dg * _padded_plane_bytes(Hs, Ws, 4)                   # hw scratch
             + 2 * _padded_plane_bytes(Dg * Hg, Wg, 4)             # att (2 bufs)
             + _padded_plane_bytes(Wg, Ws, 4)
             + _padded_plane_bytes(Hs, Hg, 4)
             + _padded_plane_bytes(Ds, 1, 4))
    budget = max(0, int(0.8 * (vmem_limit - fixed)))
    tc1, td = _pick_tiles(N, C1, Ds, Hs, Ws, itemsize, budget)

    grid = (N, C1 // tc1, Ds // td)
    out = pl.pallas_call(
        _upsample_mul_kernel,
        out_shape=jax.ShapeDtypeStruct((N, C1, Ds, Hs, Ws), fx.dtype),
        grid_spec=pltpu.PrefetchScalarGridSpec(
            num_scalar_prefetch=1,
            grid=grid,
            in_specs=[
                pl.BlockSpec((1, Dg * Hg, Wg), lambda n, c, t, *_: (n, 0, 0)),
                pl.BlockSpec((Wg, Ws), lambda n, c, t, *_: (0, 0)),
                pl.BlockSpec((Hs, Hg), lambda n, c, t, *_: (0, 0)),
                pl.BlockSpec((Ds, 1), lambda n, c, t, *_: (0, 0)),
                pl.BlockSpec((1, tc1, td, Hs, Ws),
                             lambda n, c, t, *_: (n, c, t, 0, 0)),
            ],
            out_specs=pl.BlockSpec((1, tc1, td, Hs, Ws),
                                   lambda n, c, t, *_: (n, c, t, 0, 0)),
            scratch_shapes=[pltpu.VMEM((Dg, Hs, Ws), jnp.float32)]),
        compiler_params=pltpu.CompilerParams(
            # t carries the hw scratch across iterations -> must stay serial.
            dimension_semantics=("parallel", "parallel", "arbitrary"),
            vmem_limit_bytes=vmem_limit),
    )(d0, att_hw, mwT, mh, wd, fx)

    return out


# ---------------------------------------------------------------------------
# Pure-JAX reference (gather-based trilinear) for the correctness check.
# ---------------------------------------------------------------------------
def _reference_forward(params, g, fx):
    def inorm5(x):
        m = jnp.mean(x, axis=(2, 3, 4), keepdims=True)
        v = jnp.mean(jnp.square(x - m), axis=(2, 3, 4), keepdims=True)
        return (x - m) * jax.lax.rsqrt(v + EPS)

    gf = g.astype(jnp.float32)
    ff = fx.astype(jnp.float32)
    a = inorm5(jnp.einsum("fc,ncdhw->nfdhw", params["wg"].astype(jnp.float32), gf))
    b = inorm5(jnp.einsum("fc,ncdhw->nfdhw", params["wf"].astype(jnp.float32),
                          ff[:, :, ::2, ::2, ::2]))
    r = _leaky_relu(a + b)
    o = jnp.einsum("f,nfdhw->ndhw", params["wo"][:, 0].astype(jnp.float32), r)[:, None]
    o = jax.nn.sigmoid(inorm5(o))

    _, _, Dg, Hg, Wg = o.shape
    _, _, Ds, Hs, Ws = fx.shape
    d0, d1, wd0, wd1 = _axis_src_np(Dg, Ds)
    h0, h1, wh0, wh1 = _axis_src_np(Hg, Hs)
    i0, i1, wi0, wi1 = _axis_src_np(Wg, Ws)
    xw = jnp.take(o, i0, axis=4) * wi0 + jnp.take(o, i1, axis=4) * wi1
    xh = (jnp.take(xw, h0, axis=3) * wh0[:, None]
          + jnp.take(xw, h1, axis=3) * wh1[:, None])
    xd = (jnp.take(xh, d0, axis=2) * wd0[:, None, None]
          + jnp.take(xh, d1, axis=2) * wd1[:, None, None])
    return xd * ff


if __name__ == "__main__":
    key = jax.random.PRNGKey(0)
    ks = jax.random.split(key, 5)

    # input_channels = (C0, C1), n_features = F
    N, C0, C1, Fch = 2, 8, 4, 8
    Dg = Hg = Wg = 4          # coarse ("g") spatial
    Ds = Hs = Ws = 8          # skip ("fx") spatial (2x coarse)

    g = jax.random.normal(ks[0], (N, C0, Dg, Hg, Wg), jnp.float32)
    fx = jax.random.normal(ks[1], (N, C1, Ds, Hs, Ws), jnp.float32)

    params = {
        # weight_g: Conv3d(C0 -> F, 1x1x1, bias=False) stored as (F, C0)
        "wg": 0.1 * jax.random.normal(ks[2], (Fch, C0), jnp.float32),
        # weight_fx: Conv3d(C1 -> F, 1x1x1, stride=2, bias=False) as (F, C1)
        "wf": 0.1 * jax.random.normal(ks[3], (Fch, C1), jnp.float32),
        # output: Conv3d(F -> 1, 1x1x1, bias=False) stored as (F, 1)
        "wo": 0.1 * jax.random.normal(ks[4], (Fch, 1), jnp.float32),
    }

    out = jax.jit(attention_gate_forward)(params, g, fx)
    out = jax.block_until_ready(out)
    assert out.shape == fx.shape, out.shape
    assert bool(jnp.all(jnp.isfinite(out)))

    ref = _reference_forward(params, g, fx)
    assert bool(jnp.allclose(out, ref, atol=1e-3, rtol=1e-3)), (
        float(jnp.max(jnp.abs(out - ref))))

    print("KERNEL_OK")
</pallas_src>

<mosaic_0001>
module attributes {stable_mosaic.version = 11 : i64} {
  func.func @_gate_kernel(%arg0: i32, %arg1: memref<1x8x64xf32, #tpu.memory_space<vmem>>, %arg2: memref<1x4x64xf32, #tpu.memory_space<vmem>>, %arg3: memref<8x8xf32, #tpu.memory_space<vmem>>, %arg4: memref<8x4xf32, #tpu.memory_space<vmem>>, %arg5: memref<8x1xf32, #tpu.memory_space<vmem>>, %arg6: memref<1x1x64xf32, #tpu.memory_space<vmem>>) attributes {dimension_semantics = [#tpu.dimension_semantics<parallel>], iteration_bounds = array<i64: 2>, scalar_prefetch = 0 : i64, scratch_operands = 0 : i64, tpu.core_type = #tpu.core_type<tc>, window_params = [{transform_indices = @transform_0, window_bounds = array<i64: 1, 8, 64>}, {transform_indices = @transform_1, window_bounds = array<i64: 1, 4, 64>}, {pipeline_mode = #tpu.pipeline_mode<synchronous>, transform_indices = @transform_2, window_bounds = array<i64: 8, 8>}, {pipeline_mode = #tpu.pipeline_mode<synchronous>, transform_indices = @transform_3, window_bounds = array<i64: 8, 4>}, {pipeline_mode = #tpu.pipeline_mode<synchronous>, transform_indices = @transform_4, window_bounds = array<i64: 8, 1>}, {transform_indices = @transform_5, window_bounds = array<i64: 1, 1, 64>}]} {
    %c0 = arith.constant 0 : index
    %c0_0 = arith.constant 0 : index
    %c0_1 = arith.constant 0 : index
    %0 = vector.load %arg1[%c0, %c0_0, %c0_1] : memref<1x8x64xf32, #tpu.memory_space<vmem>>, vector<1x8x64xf32>
    %1 = vector.shape_cast %0 : vector<1x8x64xf32> to vector<8x64xf32>
    %c0_2 = arith.constant 0 : index
    %c0_3 = arith.constant 0 : index
    %c0_4 = arith.constant 0 : index
    %2 = vector.load %arg2[%c0_2, %c0_3, %c0_4] : memref<1x4x64xf32, #tpu.memory_space<vmem>>, vector<1x4x64xf32>
    %3 = vector.shape_cast %2 : vector<1x4x64xf32> to vector<4x64xf32>
    %c0_5 = arith.constant 0 : index
    %c0_6 = arith.constant 0 : index
    %4 = vector.load %arg3[%c0_5, %c0_6] : memref<8x8xf32, #tpu.memory_space<vmem>>, vector<8x8xf32>
    %c0_7 = arith.constant 0 : index
    %c0_8 = arith.constant 0 : index
    %5 = vector.load %arg4[%c0_7, %c0_8] : memref<8x4xf32, #tpu.memory_space<vmem>>, vector<8x4xf32>
    %c0_9 = arith.constant 0 : index
    %c0_10 = arith.constant 0 : index
    %6 = vector.load %arg5[%c0_9, %c0_10] : memref<8x1xf32, #tpu.memory_space<vmem>>, vector<8x1xf32>
    %cst = arith.constant dense<0.000000e+00> : vector<8x64xf32>
    %7 = tpu.matmul %4, %1, %cst {dimension_numbers = #tpu.dot_dimension_numbers<[1], [0], [0], [1], [0, 0, 1, 1], [], []>} : vector<8x8xf32>, vector<8x64xf32>, vector<8x64xf32> -> vector<8x64xf32>
    %cst_11 = arith.constant dense<0.000000e+00> : vector<8xf32>
    %8 = vector.multi_reduction <add>, %7, %cst_11 [1] : vector<8x64xf32> to vector<8xf32>
    %9 = vector.shape_cast %8 : vector<8xf32> to vector<8x1xf32>
    %cst_12 = arith.constant 6.400000e+01 : f32
    %10 = vector.broadcast %cst_12 : f32 to vector<8x1xf32>
    %11 = arith.divf %9, %10 : vector<8x1xf32>
    %12 = vector.broadcast %11 : vector<8x1xf32> to vector<8x64xf32>
    %13 = arith.subf %7, %12 : vector<8x64xf32>
    %14 = arith.mulf %13, %13 : vector<8x64xf32>
    %cst_13 = arith.constant dense<0.000000e+00> : vector<8xf32>
    %15 = vector.multi_reduction <add>, %14, %cst_13 [1] : vector<8x64xf32> to vector<8xf32>
    %16 = vector.shape_cast %15 : vector<8xf32> to vector<8x1xf32>
    %cst_14 = arith.constant 6.400000e+01 : f32
    %17 = vector.broadcast %cst_14 : f32 to vector<8x1xf32>
    %18 = arith.divf %16, %17 : vector<8x1xf32>
    %19 = vector.broadcast %11 : vector<8x1xf32> to vector<8x64xf32>
    %20 = arith.subf %7, %19 : vector<8x64xf32>
    %cst_15 = arith.constant 9.99999974E-6 : f32
    %21 = vector.broadcast %cst_15 : f32 to vector<8x1xf32>
    %22 = arith.addf %18, %21 : vector<8x1xf32>
    %23 = math.rsqrt %22 : vector<8x1xf32>
    %24 = vector.broadcast %23 : vector<8x1xf32> to vector<8x64xf32>
    %25 = arith.mulf %20, %24 : vector<8x64xf32>
    %cst_16 = arith.constant dense<0.000000e+00> : vector<8x64xf32>
    %26 = tpu.matmul %5, %3, %cst_16 {dimension_numbers = #tpu.dot_dimension_numbers<[1], [0], [0], [1], [0, 0, 1, 1], [], []>} : vector<8x4xf32>, vector<4x64xf32>, vector<8x64xf32> -> vector<8x64xf32>
    %cst_17 = arith.constant dense<0.000000e+00> : vector<8xf32>
    %27 = vector.multi_reduction <add>, %26, %cst_17 [1] : vector<8x64xf32> to vector<8xf32>
    %28 = vector.shape_cast %27 : vector<8xf32> to vector<8x1xf32>
    %cst_18 = arith.constant 6.400000e+01 : f32
    %29 = vector.broadcast %cst_18 : f32 to vector<8x1xf32>
    %30 = arith.divf %28, %29 : vector<8x1xf32>
    %31 = vector.broadcast %30 : vector<8x1xf32> to vector<8x64xf32>
    %32 = arith.subf %26, %31 : vector<8x64xf32>
    %33 = arith.mulf %32, %32 : vector<8x64xf32>
    %cst_19 = arith.constant dense<0.000000e+00> : vector<8xf32>
    %34 = vector.multi_reduction <add>, %33, %cst_19 [1] : vector<8x64xf32> to vector<8xf32>
    %35 = vector.shape_cast %34 : vector<8xf32> to vector<8x1xf32>
    %cst_20 = arith.constant 6.400000e+01 : f32
    %36 = vector.broadcast %cst_20 : f32 to vector<8x1xf32>
    %37 = arith.divf %35, %36 : vector<8x1xf32>
    %38 = vector.broadcast %30 : vector<8x1xf32> to vector<8x64xf32>
    %39 = arith.subf %26, %38 : vector<8x64xf32>
    %cst_21 = arith.constant 9.99999974E-6 : f32
    %40 = vector.broadcast %cst_21 : f32 to vector<8x1xf32>
    %41 = arith.addf %37, %40 : vector<8x1xf32>
    %42 = math.rsqrt %41 : vector<8x1xf32>
    %43 = vector.broadcast %42 : vector<8x1xf32> to vector<8x64xf32>
    %44 = arith.mulf %39, %43 : vector<8x64xf32>
    %45 = arith.addf %25, %44 : vector<8x64xf32>
    %cst_22 = arith.constant 0.000000e+00 : f32
    %46 = vector.broadcast %cst_22 : f32 to vector<8x64xf32>
    %47 = arith.cmpf oge, %45, %46 : vector<8x64xf32>
    %cst_23 = arith.constant 0.00999999977 : f32
    %48 = vector.broadcast %cst_23 : f32 to vector<8x64xf32>
    %49 = arith.mulf %48, %45 : vector<8x64xf32>
    %50 = arith.select %47, %45, %49 : vector<8x64xi1>, vector<8x64xf32>
    %51 = vector.broadcast %6 : vector<8x1xf32> to vector<8x64xf32>
    %52 = arith.mulf %50, %51 : vector<8x64xf32>
    %cst_24 = arith.constant dense<0.000000e+00> : vector<64xf32>
    %53 = vector.multi_reduction <add>, %52, %cst_24 [0] : vector<8x64xf32> to vector<64xf32>
    %54 = vector.shape_cast %53 : vector<64xf32> to vector<1x64xf32>
    %cst_25 = arith.constant dense<0.000000e+00> : vector<1xf32>
    %55 = vector.multi_reduction <add>, %54, %cst_25 [1] : vector<1x64xf32> to vector<1xf32>
    %56 = vector.shape_cast %55 : vector<1xf32> to vector<1x1xf32>
    %cst_26 = arith.constant 6.400000e+01 : f32
    %57 = vector.broadcast %cst_26 : f32 to vector<1x1xf32>
    %58 = arith.divf %56, %57 : vector<1x1xf32>
    %59 = vector.broadcast %58 : vector<1x1xf32> to vector<1x64xf32>
    %60 = arith.subf %54, %59 : vector<1x64xf32>
    %61 = arith.mulf %60, %60 : vector<1x64xf32>
    %cst_27 = arith.constant dense<0.000000e+00> : vector<1xf32>
    %62 = vector.multi_reduction <add>, %61, %cst_27 [1] : vector<1x64xf32> to vector<1xf32>
    %63 = vector.shape_cast %62 : vector<1xf32> to vector<1x1xf32>
    %cst_28 = arith.constant 6.400000e+01 : f32
    %64 = vector.broadcast %cst_28 : f32 to vector<1x1xf32>
    %65 = arith.divf %63, %64 : vector<1x1xf32>
    %66 = vector.broadcast %58 : vector<1x1xf32> to vector<1x64xf32>
    %67 = arith.subf %54, %66 : vector<1x64xf32>
    %cst_29 = arith.constant 9.99999974E-6 : f32
    %68 = vector.broadcast %cst_29 : f32 to vector<1x1xf32>
    %69 = arith.addf %65, %68 : vector<1x1xf32>
    %70 = math.rsqrt %69 : vector<1x1xf32>
    %71 = vector.broadcast %70 : vector<1x1xf32> to vector<1x64xf32>
    %72 = arith.mulf %67, %71 : vector<1x64xf32>
    %73 = arith.negf %72 : vector<1x64xf32>
    %74 = math.exp %73 : vector<1x64xf32>
    %cst_30 = arith.constant 1.000000e+00 : f32
    %75 = vector.broadcast %cst_30 : f32 to vector<1x64xf32>
    %76 = arith.addf %75, %74 : vector<1x64xf32>
    %77 = arith.divf %75, %76 : vector<1x64xf32>
    %c0_31 = arith.constant 0 : index
    %c0_32 = arith.constant 0 : index
    %c0_33 = arith.constant 0 : index
    %78 = vector.load %arg6[%c0_31, %c0_32, %c0_33] : memref<1x1x64xf32, #tpu.memory_space<vmem>>, vector<1x1x64xf32>
    %79 = vector.shape_cast %78 : vector<1x1x64xf32> to vector<1x64xf32>
    %80 = vector.shape_cast %77 : vector<1x64xf32> to vector<1x1x64xf32>
    tpu.vector_store %arg6[%c0_31, %c0_32, %c0_33], %80 {strides = array<i32>} : memref<1x1x64xf32, #tpu.memory_space<vmem>>, vector<1x1x64xf32>,
    return
  }
  func.func @transform_0(%arg0: i32) -> (i32, i32, i32) {
    %c0_i32 = arith.constant 0 : i32
    %c0_i32_0 = arith.constant 0 : i32
    %c0_i32_1 = arith.constant 0 : i32
    return %arg0, %c0_i32, %c0_i32_0 : i32, i32, i32
  }
  func.func @transform_1(%arg0: i32) -> (i32, i32, i32) {
    %c0_i32 = arith.constant 0 : i32
    %c0_i32_0 = arith.constant 0 : i32
    %c0_i32_1 = arith.constant 0 : i32
    return %arg0, %c0_i32, %c0_i32_0 : i32, i32, i32
  }
  func.func @transform_2(%arg0: i32) -> (i32, i32) {
    %c0_i32 = arith.constant 0 : i32
    %c0_i32_0 = arith.constant 0 : i32
    %c0_i32_1 = arith.constant 0 : i32
    return %c0_i32, %c0_i32_0 : i32, i32
  }
  func.func @transform_3(%arg0: i32) -> (i32, i32) {
    %c0_i32 = arith.constant 0 : i32
    %c0_i32_0 = arith.constant 0 : i32
    %c0_i32_1 = arith.constant 0 : i32
    return %c0_i32, %c0_i32_0 : i32, i32
  }
  func.func @transform_4(%arg0: i32) -> (i32, i32) {
    %c0_i32 = arith.constant 0 : i32
    %c0_i32_0 = arith.constant 0 : i32
    %c0_i32_1 = arith.constant 0 : i32
    return %c0_i32, %c0_i32_0 : i32, i32
  }
  func.func @transform_5(%arg0: i32) -> (i32, i32, i32) {
    %c0_i32 = arith.constant 0 : i32
    %c0_i32_0 = arith.constant 0 : i32
    %c0_i32_1 = arith.constant 0 : i32
    return %arg0, %c0_i32, %c0_i32_0 : i32, i32, i32
  }
}

module attributes {stable_mosaic.version = 11 : i64} {
  func.func @_upsample_mul_kernel(%arg0: i32, %arg1: i32, %arg2: i32, %arg3: memref<8xi32, #tpu.memory_space<smem>>, %arg4: memref<1x16x4xf32, #tpu.memory_space<vmem>>, %arg5: memref<4x8xf32, #tpu.memory_space<vmem>>, %arg6: memref<8x4xf32, #tpu.memory_space<vmem>>, %arg7: memref<8x1xf32, #tpu.memory_space<vmem>>, %arg8: memref<1x4x8x8x8xf32, #tpu.memory_space<vmem>>, %arg9: memref<1x4x8x8x8xf32, #tpu.memory_space<vmem>>, %arg10: memref<4x8x8xf32, #tpu.memory_space<vmem>>) attributes {dimension_semantics = [#tpu.dimension_semantics<parallel>, #tpu.dimension_semantics<parallel>, #tpu.dimension_semantics<arbitrary>], iteration_bounds = array<i64: 2, 1, 1>, scalar_prefetch = 1 : i64, scratch_operands = 1 : i64, tpu.core_type = #tpu.core_type<tc>, window_params = [{transform_indices = @transform_0, window_bounds = array<i64: 1, 16, 4>}, {pipeline_mode = #tpu.pipeline_mode<synchronous>, transform_indices = @transform_1, window_bounds = array<i64: 4, 8>}, {pipeline_mode = #tpu.pipeline_mode<synchronous>, transform_indices = @transform_2, window_bounds = array<i64: 8, 4>}, {pipeline_mode = #tpu.pipeline_mode<synchronous>, transform_indices = @transform_3, window_bounds = array<i64: 8, 1>}, {transform_indices = @transform_4, window_bounds = array<i64: 1, 4, 8, 8, 8>}, {transform_indices = @transform_5, window_bounds = array<i64: 1, 4, 8, 8, 8>}]} {
    %c0_i32 = arith.constant 0 : i32
    %0 = arith.cmpi eq, %arg2, %c0_i32 : i32
    %1 = arith.extui %0 : i1 to i32
    %c0_i32_0 = arith.constant 0 : i32
    %2 = arith.cmpi ne, %1, %c0_i32_0 : i32
    scf.if %2 {
      %c0_144 = arith.constant 0 : index
      %c0_145 = arith.constant 0 : index
      %c0_146 = arith.constant 0 : index
      %227 = vector.load %arg4[%c0_144, %c0_145, %c0_146] : memref<1x16x4xf32, #tpu.memory_space<vmem>>, vector<1x16x4xf32>
      %228 = vector.shape_cast %227 : vector<1x16x4xf32> to vector<16x4xf32>
      %c0_147 = arith.constant 0 : index
      %c0_148 = arith.constant 0 : index
      %229 = vector.load %arg5[%c0_147, %c0_148] : memref<4x8xf32, #tpu.memory_space<vmem>>, vector<4x8xf32>
      %cst_149 = arith.constant dense<0.000000e+00> : vector<16x8xf32>
      %230 = tpu.matmul %228, %229, %cst_149 {dimension_numbers = #tpu.dot_dimension_numbers<[1], [0], [0], [1], [0, 0, 1, 1], [], []>} : vector<16x4xf32>, vector<4x8xf32>, vector<16x8xf32> -> vector<16x8xf32>
      %c0_150 = arith.constant 0 : index
      %c0_151 = arith.constant 0 : index
      %231 = vector.load %arg6[%c0_150, %c0_151] : memref<8x4xf32, #tpu.memory_space<vmem>>, vector<8x4xf32>
      %232 = vector.extract_strided_slice %230 {offsets = [0, 0], sizes = [4, 8], strides = [1, 1]} : vector<16x8xf32> to vector<4x8xf32>
      %cst_152 = arith.constant dense<0.000000e+00> : vector<8x8xf32>
      %233 = tpu.matmul %231, %232, %cst_152 {dimension_numbers = #tpu.dot_dimension_numbers<[1], [0], [0], [1], [0, 0, 1, 1], [], []>} : vector<8x4xf32>, vector<4x8xf32>, vector<8x8xf32> -> vector<8x8xf32>
      %c0_153 = arith.constant 0 : index
      %c0_154 = arith.constant 0 : index
      %c0_155 = arith.constant 0 : index
      %234 = vector.load %arg10[%c0_153, %c0_154, %c0_155] : memref<4x8x8xf32, #tpu.memory_space<vmem>>, vector<1x8x8xf32>
      %235 = vector.shape_cast %234 : vector<1x8x8xf32> to vector<8x8xf32>
      %236 = vector.shape_cast %233 : vector<8x8xf32> to vector<1x8x8xf32>
      tpu.vector_store %arg10[%c0_153, %c0_154, %c0_155], %236 {strides = array<i32>} : memref<4x8x8xf32, #tpu.memory_space<vmem>>, vector<1x8x8xf32>,
      %237 = vector.extract_strided_slice %230 {offsets = [4, 0], sizes = [4, 8], strides = [1, 1]} : vector<16x8xf32> to vector<4x8xf32>
      %cst_156 = arith.constant dense<0.000000e+00> : vector<8x8xf32>
      %238 = tpu.matmul %231, %237, %cst_156 {dimension_numbers = #tpu.dot_dimension_numbers<[1], [0], [0], [1], [0, 0, 1, 1], [], []>} : vector<8x4xf32>, vector<4x8xf32>, vector<8x8xf32> -> vector<8x8xf32>
      %c1_157 = arith.constant 1 : index
      %c0_158 = arith.constant 0 : index
      %c0_159 = arith.constant 0 : index
      %239 = vector.load %arg10[%c1_157, %c0_158, %c0_159] : memref<4x8x8xf32, #tpu.memory_space<vmem>>, vector<1x8x8xf32>
      %240 = vector.shape_cast %239 : vector<1x8x8xf32> to vector<8x8xf32>
      %241 = vector.shape_cast %238 : vector<8x8xf32> to vector<1x8x8xf32>
      tpu.vector_store %arg10[%c1_157, %c0_158, %c0_159], %241 {strides = array<i32>} : memref<4x8x8xf32, #tpu.memory_space<vmem>>, vector<1x8x8xf32>,
      %242 = vector.extract_strided_slice %230 {offsets = [8, 0], sizes = [4, 8], strides = [1, 1]} : vector<16x8xf32> to vector<4x8xf32>
      %cst_160 = arith.constant dense<0.000000e+00> : vector<8x8xf32>
      %243 = tpu.matmul %231, %242, %cst_160 {dimension_numbers = #tpu.dot_dimension_numbers<[1], [0], [0], [1], [0, 0, 1, 1], [], []>} : vector<8x4xf32>, vector<4x8xf32>, vector<8x8xf32> -> vector<8x8xf32>
      %c2_161 = arith.constant 2 : index
      %c0_162 = arith.constant 0 : index
      %c0_163 = arith.constant 0 : index
      %244 = vector.load %arg10[%c2_161, %c0_162, %c0_163] : memref<4x8x8xf32, #tpu.memory_space<vmem>>, vector<1x8x8xf32>
      %245 = vector.shape_cast %244 : vector<1x8x8xf32> to vector<8x8xf32>
      %246 = vector.shape_cast %243 : vector<8x8xf32> to vector<1x8x8xf32>
      tpu.vector_store %arg10[%c2_161, %c0_162, %c0_163], %246 {strides = array<i32>} : memref<4x8x8xf32, #tpu.memory_space<vmem>>, vector<1x8x8xf32>,
      %247 = vector.extract_strided_slice %230 {offsets = [12, 0], sizes = [4, 8], strides = [1, 1]} : vector<16x8xf32> to vector<4x8xf32>
      %cst_164 = arith.constant dense<0.000000e+00> : vector<8x8xf32>
      %248 = tpu.matmul %231, %247, %cst_164 {dimension_numbers = #tpu.dot_dimension_numbers<[1], [0], [0], [1], [0, 0, 1, 1], [], []>} : vector<8x4xf32>, vector<4x8xf32>, vector<8x8xf32> -> vector<8x8xf32>
      %c3_165 = arith.constant 3 : index
      %c0_166 = arith.constant 0 : index
      %c0_167 = arith.constant 0 : index
      %249 = vector.load %arg10[%c3_165, %c0_166, %c0_167] : memref<4x8x8xf32, #tpu.memory_space<vmem>>, vector<1x8x8xf32>
      %250 = vector.shape_cast %249 : vector<1x8x8xf32> to vector<8x8xf32>
      %251 = vector.shape_cast %248 : vector<8x8xf32> to vector<1x8x8xf32>
      tpu.vector_store %arg10[%c3_165, %c0_166, %c0_167], %251 {strides = array<i32>} : memref<4x8x8xf32, #tpu.memory_space<vmem>>, vector<1x8x8xf32>,
    } else {
    }
    %c8_i32 = arith.constant 8 : i32
    %3 = arith.muli %arg2, %c8_i32 : i32
    %c0_i32_1 = arith.constant 0 : i32
    %4 = arith.addi %3, %c0_i32_1 : i32
    %5 = arith.index_cast %4 : i32 to index
    %6 = memref.load %arg3[%5] : memref<8xi32, #tpu.memory_space<smem>>
    %c1_i32 = arith.constant 1 : i32
    %7 = arith.addi %6, %c1_i32 : i32
    %c3_i32 = arith.constant 3 : i32
    %8 = arith.minsi %7, %c3_i32 : i32
    %9 = arith.index_cast %4 : i32 to index
    %c0 = arith.constant 0 : index
    %10 = vector.load %arg7[%9, %c0] : memref<8x1xf32, #tpu.memory_space<vmem>>, vector<1x1xf32>
    %11 = arith.index_cast %6 : i32 to index
    %c0_2 = arith.constant 0 : index
    %c0_3 = arith.constant 0 : index
    %12 = vector.load %arg10[%11, %c0_2, %c0_3] : memref<4x8x8xf32, #tpu.memory_space<vmem>>, vector<1x8x8xf32>
    %13 = arith.index_cast %8 : i32 to index
    %c0_4 = arith.constant 0 : index
    %c0_5 = arith.constant 0 : index
    %14 = vector.load %arg10[%13, %c0_4, %c0_5] : memref<4x8x8xf32, #tpu.memory_space<vmem>>, vector<1x8x8xf32>
    %cst = arith.constant 1.000000e+00 : f32
    %15 = vector.broadcast %cst : f32 to vector<1x1xf32>
    %16 = arith.subf %15, %10 : vector<1x1xf32>
    %17 = vector.shape_cast %16 : vector<1x1xf32> to vector<1x1x1xf32>
    %18 = vector.broadcast %17 : vector<1x1x1xf32> to vector<1x8x8xf32>
    %19 = arith.mulf %12, %18 : vector<1x8x8xf32>
    %20 = vector.shape_cast %10 : vector<1x1xf32> to vector<1x1x1xf32>
    %21 = vector.broadcast %20 : vector<1x1x1xf32> to vector<1x8x8xf32>
    %22 = arith.mulf %14, %21 : vector<1x8x8xf32>
    %23 = arith.addf %19, %22 : vector<1x8x8xf32>
    %c0_6 = arith.constant 0 : index
    %c0_7 = arith.constant 0 : index
    %c0_8 = arith.constant 0 : index
    %c0_9 = arith.constant 0 : index
    %c0_10 = arith.constant 0 : index
    %24 = vector.load %arg8[%c0_6, %c0_7, %c0_8, %c0_9, %c0_10] : memref<1x4x8x8x8xf32, #tpu.memory_space<vmem>>, vector<1x4x1x8x8xf32>
    %25 = vector.shape_cast %24 : vector<1x4x1x8x8xf32> to vector<4x8x8xf32>
    %26 = vector.broadcast %23 : vector<1x8x8xf32> to vector<4x8x8xf32>
    %27 = arith.mulf %25, %26 : vector<4x8x8xf32>
    %c0_11 = arith.constant 0 : index
    %c0_12 = arith.constant 0 : index
    %c0_13 = arith.constant 0 : index
    %c0_14 = arith.constant 0 : index
    %c0_15 = arith.constant 0 : index
    %28 = vector.load %arg9[%c0_11, %c0_12, %c0_13, %c0_14, %c0_15] : memref<1x4x8x8x8xf32, #tpu.memory_space<vmem>>, vector<1x4x1x8x8xf32>
    %29 = vector.shape_cast %28 : vector<1x4x1x8x8xf32> to vector<4x8x8xf32>
    %30 = vector.shape_cast %27 : vector<4x8x8xf32> to vector<1x4x1x8x8xf32>
    tpu.vector_store %arg9[%c0_11, %c0_12, %c0_13, %c0_14, %c0_15], %30 {strides = array<i32>} : memref<1x4x8x8x8xf32, #tpu.memory_space<vmem>>, vector<1x4x1x8x8xf32>,
    %c8_i32_16 = arith.constant 8 : i32
    %31 = arith.muli %arg2, %c8_i32_16 : i32
    %c1_i32_17 = arith.constant 1 : i32
    %32 = arith.addi %31, %c1_i32_17 : i32
    %33 = arith.index_cast %32 : i32 to index
    %34 = memref.load %arg3[%33] : memref<8xi32, #tpu.memory_space<smem>>
    %c1_i32_18 = arith.constant 1 : i32
    %35 = arith.addi %34, %c1_i32_18 : i32
    %c3_i32_19 = arith.constant 3 : i32
    %36 = arith.minsi %35, %c3_i32_19 : i32
    %37 = arith.index_cast %32 : i32 to index
    %c0_20 = arith.constant 0 : index
    %38 = vector.load %arg7[%37, %c0_20] : memref<8x1xf32, #tpu.memory_space<vmem>>, vector<1x1xf32>
    %39 = arith.index_cast %34 : i32 to index
    %c0_21 = arith.constant 0 : index
    %c0_22 = arith.constant 0 : index
    %40 = vector.load %arg10[%39, %c0_21, %c0_22] : memref<4x8x8xf32, #tpu.memory_space<vmem>>, vector<1x8x8xf32>
    %41 = arith.index_cast %36 : i32 to index
    %c0_23 = arith.constant 0 : index
    %c0_24 = arith.constant 0 : index
    %42 = vector.load %arg10[%41, %c0_23, %c0_24] : memref<4x8x8xf32, #tpu.memory_space<vmem>>, vector<1x8x8xf32>
    %cst_25 = arith.constant 1.000000e+00 : f32
    %43 = vector.broadcast %cst_25 : f32 to vector<1x1xf32>
    %44 = arith.subf %43, %38 : vector<1x1xf32>
    %45 = vector.shape_cast %44 : vector<1x1xf32> to vector<1x1x1xf32>
    %46 = vector.broadcast %45 : vector<1x1x1xf32> to vector<1x8x8xf32>
    %47 = arith.mulf %40, %46 : vector<1x8x8xf32>
    %48 = vector.shape_cast %38 : vector<1x1xf32> to vector<1x1x1xf32>
    %49 = vector.broadcast %48 : vector<1x1x1xf32> to vector<1x8x8xf32>
    %50 = arith.mulf %42, %49 : vector<1x8x8xf32>
    %51 = arith.addf %47, %50 : vector<1x8x8xf32>
    %c0_26 = arith.constant 0 : index
    %c0_27 = arith.constant 0 : index
    %c1 = arith.constant 1 : index
    %c0_28 = arith.constant 0 : index
    %c0_29 = arith.constant 0 : index
    %52 = vector.load %arg8[%c0_26, %c0_27, %c1, %c0_28, %c0_29] : memref<1x4x8x8x8xf32, #tpu.memory_space<vmem>>, vector<1x4x1x8x8xf32>
    %53 = vector.shape_cast %52 : vector<1x4x1x8x8xf32> to vector<4x8x8xf32>
    %54 = vector.broadcast %51 : vector<1x8x8xf32> to vector<4x8x8xf32>
    %55 = arith.mulf %53, %54 : vector<4x8x8xf32>
    %c0_30 = arith.constant 0 : index
    %c0_31 = arith.constant 0 : index
    %c1_32 = arith.constant 1 : index
    %c0_33 = arith.constant 0 : index
    %c0_34 = arith.constant 0 : index
    %56 = vector.load %arg9[%c0_30, %c0_31, %c1_32, %c0_33, %c0_34] : memref<1x4x8x8x8xf32, #tpu.memory_space<vmem>>, vector<1x4x1x8x8xf32>
    %57 = vector.shape_cast %56 : vector<1x4x1x8x8xf32> to vector<4x8x8xf32>
    %58 = vector.shape_cast %55 : vector<4x8x8xf32> to vector<1x4x1x8x8xf32>
    tpu.vector_store %arg9[%c0_30, %c0_31, %c1_32, %c0_33, %c0_34], %58 {strides = array<i32>} : memref<1x4x8x8x8xf32, #tpu.memory_space<vmem>>, vector<1x4x1x8x8xf32>,
    %c8_i32_35 = arith.constant 8 : i32
    %59 = arith.muli %arg2, %c8_i32_35 : i32
    %c2_i32 = arith.constant 2 : i32
    %60 = arith.addi %59, %c2_i32 : i32
    %61 = arith.index_cast %60 : i32 to index
    %62 = memref.load %arg3[%61] : memref<8xi32, #tpu.memory_space<smem>>
    %c1_i32_36 = arith.constant 1 : i32
    %63 = arith.addi %62, %c1_i32_36 : i32
    %c3_i32_37 = arith.constant 3 : i32
    %64 = arith.minsi %63, %c3_i32_37 : i32
    %65 = arith.index_cast %60 : i32 to index
    %c0_38 = arith.constant 0 : index
    %66 = vector.load %arg7[%65, %c0_38] : memref<8x1xf32, #tpu.memory_space<vmem>>, vector<1x1xf32>
    %67 = arith.index_cast %62 : i32 to index
    %c0_39 = arith.constant 0 : index
    %c0_40 = arith.constant 0 : index
    %68 = vector.load %arg10[%67, %c0_39, %c0_40] : memref<4x8x8xf32, #tpu.memory_space<vmem>>, vector<1x8x8xf32>
    %69 = arith.index_cast %64 : i32 to index
    %c0_41 = arith.constant 0 : index
    %c0_42 = arith.constant 0 : index
    %70 = vector.load %arg10[%69, %c0_41, %c0_42] : memref<4x8x8xf32, #tpu.memory_space<vmem>>, vector<1x8x8xf32>
    %cst_43 = arith.constant 1.000000e+00 : f32
    %71 = vector.broadcast %cst_43 : f32 to vector<1x1xf32>
    %72 = arith.subf %71, %66 : vector<1x1xf32>
    %73 = vector.shape_cast %72 : vector<1x1xf32> to vector<1x1x1xf32>
    %74 = vector.broadcast %73 : vector<1x1x1xf32> to vector<1x8x8xf32>
    %75 = arith.mulf %68, %74 : vector<1x8x8xf32>
    %76 = vector.shape_cast %66 : vector<1x1xf32> to vector<1x1x1xf32>
    %77 = vector.broadcast %76 : vector<1x1x1xf32> to vector<1x8x8xf32>
    %78 = arith.mulf %70, %77 : vector<1x8x8xf32>
    %79 = arith.addf %75, %78 : vector<1x8x8xf32>
    %c0_44 = arith.constant 0 : index
    %c0_45 = arith.constant 0 : index
    %c2 = arith.constant 2 : index
    %c0_46 = arith.constant 0 : index
    %c0_47 = arith.constant 0 : index
    %80 = vector.load %arg8[%c0_44, %c0_45, %c2, %c0_46, %c0_47] : memref<1x4x8x8x8xf32, #tpu.memory_space<vmem>>, vector<1x4x1x8x8xf32>
    %81 = vector.shape_cast %80 : vector<1x4x1x8x8xf32> to vector<4x8x8xf32>
    %82 = vector.broadcast %79 : vector<1x8x8xf32> to vector<4x8x8xf32>
    %83 = arith.mulf %81, %82 : vector<4x8x8xf32>
    %c0_48 = arith.constant 0 : index
    %c0_49 = arith.constant 0 : index
    %c2_50 = arith.constant 2 : index
    %c0_51 = arith.constant 0 : index
    %c0_52 = arith.constant 0 : index
    %84 = vector.load %arg9[%c0_48, %c0_49, %c2_50, %c0_51, %c0_52] : memref<1x4x8x8x8xf32, #tpu.memory_space<vmem>>, vector<1x4x1x8x8xf32>
    %85 = vector.shape_cast %84 : vector<1x4x1x8x8xf32> to vector<4x8x8xf32>
    %86 = vector.shape_cast %83 : vector<4x8x8xf32> to vector<1x4x1x8x8xf32>
    tpu.vector_store %arg9[%c0_48, %c0_49, %c2_50, %c0_51, %c0_52], %86 {strides = array<i32>} : memref<1x4x8x8x8xf32, #tpu.memory_space<vmem>>, vector<1x4x1x8x8xf32>,
    %c8_i32_53 = arith.constant 8 : i32
    %87 = arith.muli %arg2, %c8_i32_53 : i32
    %c3_i32_54 = arith.constant 3 : i32
    %88 = arith.addi %87, %c3_i32_54 : i32
    %89 = arith.index_cast %88 : i32 to index
    %90 = memref.load %arg3[%89] : memref<8xi32, #tpu.memory_space<smem>>
    %c1_i32_55 = arith.constant 1 : i32
    %91 = arith.addi %90, %c1_i32_55 : i32
    %c3_i32_56 = arith.constant 3 : i32
    %92 = arith.minsi %91, %c3_i32_56 : i32
    %93 = arith.index_cast %88 : i32 to index
    %c0_57 = arith.constant 0 : index
    %94 = vector.load %arg7[%93, %c0_57] : memref<8x1xf32, #tpu.memory_space<vmem>>, vector<1x1xf32>
    %95 = arith.index_cast %90 : i32 to index
    %c0_58 = arith.constant 0 : index
    %c0_59 = arith.constant 0 : index
    %96 = vector.load %arg10[%95, %c0_58, %c0_59] : memref<4x8x8xf32, #tpu.memory_space<vmem>>, vector<1x8x8xf32>
    %97 = arith.index_cast %92 : i32 to index
    %c0_60 = arith.constant 0 : index
    %c0_61 = arith.constant 0 : index
    %98 = vector.load %arg10[%97, %c0_60, %c0_61] : memref<4x8x8xf32, #tpu.memory_space<vmem>>, vector<1x8x8xf32>
    %cst_62 = arith.constant 1.000000e+00 : f32
    %99 = vector.broadcast %cst_62 : f32 to vector<1x1xf32>
    %100 = arith.subf %99, %94 : vector<1x1xf32>
    %101 = vector.shape_cast %100 : vector<1x1xf32> to vector<1x1x1xf32>
    %102 = vector.broadcast %101 : vector<1x1x1xf32> to vector<1x8x8xf32>
    %103 = arith.mulf %96, %102 : vector<1x8x8xf32>
    %104 = vector.shape_cast %94 : vector<1x1xf32> to vector<1x1x1xf32>
    %105 = vector.broadcast %104 : vector<1x1x1xf32> to vector<1x8x8xf32>
    %106 = arith.mulf %98, %105 : vector<1x8x8xf32>
    %107 = arith.addf %103, %106 : vector<1x8x8xf32>
    %c0_63 = arith.constant 0 : index
    %c0_64 = arith.constant 0 : index
    %c3 = arith.constant 3 : index
    %c0_65 = arith.constant 0 : index
    %c0_66 = arith.constant 0 : index
    %108 = vector.load %arg8[%c0_63, %c0_64, %c3, %c0_65, %c0_66] : memref<1x4x8x8x8xf32, #tpu.memory_space<vmem>>, vector<1x4x1x8x8xf32>
    %109 = vector.shape_cast %108 : vector<1x4x1x8x8xf32> to vector<4x8x8xf32>
    %110 = vector.broadcast %107 : vector<1x8x8xf32> to vector<4x8x8xf32>
    %111 = arith.mulf %109, %110 : vector<4x8x8xf32>
    %c0_67 = arith.constant 0 : index
    %c0_68 = arith.constant 0 : index
    %c3_69 = arith.constant 3 : index
    %c0_70 = arith.constant 0 : index
    %c0_71 = arith.constant 0 : index
    %112 = vector.load %arg9[%c0_67, %c0_68, %c3_69, %c0_70, %c0_71] : memref<1x4x8x8x8xf32, #tpu.memory_space<vmem>>, vector<1x4x1x8x8xf32>
    %113 = vector.shape_cast %112 : vector<1x4x1x8x8xf32> to vector<4x8x8xf32>
    %114 = vector.shape_cast %111 : vector<4x8x8xf32> to vector<1x4x1x8x8xf32>
    tpu.vector_store %arg9[%c0_67, %c0_68, %c3_69, %c0_70, %c0_71], %114 {strides = array<i32>} : memref<1x4x8x8x8xf32, #tpu.memory_space<vmem>>, vector<1x4x1x8x8xf32>,
    %c8_i32_72 = arith.constant 8 : i32
    %115 = arith.muli %arg2, %c8_i32_72 : i32
    %c4_i32 = arith.constant 4 : i32
    %116 = arith.addi %115, %c4_i32 : i32
    %117 = arith.index_cast %116 : i32 to index
    %118 = memref.load %arg3[%117] : memref<8xi32, #tpu.memory_space<smem>>
    %c1_i32_73 = arith.constant 1 : i32
    %119 = arith.addi %118, %c1_i32_73 : i32
    %c3_i32_74 = arith.constant 3 : i32
    %120 = arith.minsi %119, %c3_i32_74 : i32
    %121 = arith.index_cast %116 : i32 to index
    %c0_75 = arith.constant 0 : index
    %122 = vector.load %arg7[%121, %c0_75] : memref<8x1xf32, #tpu.memory_space<vmem>>, vector<1x1xf32>
    %123 = arith.index_cast %118 : i32 to index
    %c0_76 = arith.constant 0 : index
    %c0_77 = arith.constant 0 : index
    %124 = vector.load %arg10[%123, %c0_76, %c0_77] : memref<4x8x8xf32, #tpu.memory_space<vmem>>, vector<1x8x8xf32>
    %125 = arith.index_cast %120 : i32 to index
    %c0_78 = arith.constant 0 : index
    %c0_79 = arith.constant 0 : index
    %126 = vector.load %arg10[%125, %c0_78, %c0_79] : memref<4x8x8xf32, #tpu.memory_space<vmem>>, vector<1x8x8xf32>
    %cst_80 = arith.constant 1.000000e+00 : f32
    %127 = vector.broadcast %cst_80 : f32 to vector<1x1xf32>
    %128 = arith.subf %127, %122 : vector<1x1xf32>
    %129 = vector.shape_cast %128 : vector<1x1xf32> to vector<1x1x1xf32>
    %130 = vector.broadcast %129 : vector<1x1x1xf32> to vector<1x8x8xf32>
    %131 = arith.mulf %124, %130 : vector<1x8x8xf32>
    %132 = vector.shape_cast %122 : vector<1x1xf32> to vector<1x1x1xf32>
    %133 = vector.broadcast %132 : vector<1x1x1xf32> to vector<1x8x8xf32>
    %134 = arith.mulf %126, %133 : vector<1x8x8xf32>
    %135 = arith.addf %131, %134 : vector<1x8x8xf32>
    %c0_81 = arith.constant 0 : index
    %c0_82 = arith.constant 0 : index
    %c4 = arith.constant 4 : index
    %c0_83 = arith.constant 0 : index
    %c0_84 = arith.constant 0 : index
    %136 = vector.load %arg8[%c0_81, %c0_82, %c4, %c0_83, %c0_84] : memref<1x4x8x8x8xf32, #tpu.memory_space<vmem>>, vector<1x4x1x8x8xf32>
    %137 = vector.shape_cast %136 : vector<1x4x1x8x8xf32> to vector<4x8x8xf32>
    %138 = vector.broadcast %135 : vector<1x8x8xf32> to vector<4x8x8xf32>
    %139 = arith.mulf %137, %138 : vector<4x8x8xf32>
    %c0_85 = arith.constant 0 : index
    %c0_86 = arith.constant 0 : index
    %c4_87 = arith.constant 4 : index
    %c0_88 = arith.constant 0 : index
    %c0_89 = arith.constant 0 : index
    %140 = vector.load %arg9[%c0_85, %c0_86, %c4_87, %c0_88, %c0_89] : memref<1x4x8x8x8xf32, #tpu.memory_space<vmem>>, vector<1x4x1x8x8xf32>
    %141 = vector.shape_cast %140 : vector<1x4x1x8x8xf32> to vector<4x8x8xf32>
    %142 = vector.shape_cast %139 : vector<4x8x8xf32> to vector<1x4x1x8x8xf32>
    tpu.vector_store %arg9[%c0_85, %c0_86, %c4_87, %c0_88, %c0_89], %142 {strides = array<i32>} : memref<1x4x8x8x8xf32, #tpu.memory_space<vmem>>, vector<1x4x1x8x8xf32>,
    %c8_i32_90 = arith.constant 8 : i32
    %143 = arith.muli %arg2, %c8_i32_90 : i32
    %c5_i32 = arith.constant 5 : i32
    %144 = arith.addi %143, %c5_i32 : i32
    %145 = arith.index_cast %144 : i32 to index
    %146 = memref.load %arg3[%145] : memref<8xi32, #tpu.memory_space<smem>>
    %c1_i32_91 = arith.constant 1 : i32
    %147 = arith.addi %146, %c1_i32_91 : i32
    %c3_i32_92 = arith.constant 3 : i32
    %148 = arith.minsi %147, %c3_i32_92 : i32
    %149 = arith.index_cast %144 : i32 to index
    %c0_93 = arith.constant 0 : index
    %150 = vector.load %arg7[%149, %c0_93] : memref<8x1xf32, #tpu.memory_space<vmem>>, vector<1x1xf32>
    %151 = arith.index_cast %146 : i32 to index
    %c0_94 = arith.constant 0 : index
    %c0_95 = arith.constant 0 : index
    %152 = vector.load %arg10[%151, %c0_94, %c0_95] : memref<4x8x8xf32, #tpu.memory_space<vmem>>, vector<1x8x8xf32>
    %153 = arith.index_cast %148 : i32 to index
    %c0_96 = arith.constant 0 : index
    %c0_97 = arith.constant 0 : index
    %154 = vector.load %arg10[%153, %c0_96, %c0_97] : memref<4x8x8xf32, #tpu.memory_space<vmem>>, vector<1x8x8xf32>
    %cst_98 = arith.constant 1.000000e+00 : f32
    %155 = vector.broadcast %cst_98 : f32 to vector<1x1xf32>
    %156 = arith.subf %155, %150 : vector<1x1xf32>
    %157 = vector.shape_cast %156 : vector<1x1xf32> to vector<1x1x1xf32>
    %158 = vector.broadcast %157 : vector<1x1x1xf32> to vector<1x8x8xf32>
    %159 = arith.mulf %152, %158 : vector<1x8x8xf32>
    %160 = vector.shape_cast %150 : vector<1x1xf32> to vector<1x1x1xf32>
    %161 = vector.broadcast %160 : vector<1x1x1xf32> to vector<1x8x8xf32>
    %162 = arith.mulf %154, %161 : vector<1x8x8xf32>
    %163 = arith.addf %159, %162 : vector<1x8x8xf32>
    %c0_99 = arith.constant 0 : index
    %c0_100 = arith.constant 0 : index
    %c5 = arith.constant 5 : index
    %c0_101 = arith.constant 0 : index
    %c0_102 = arith.constant 0 : index
    %164 = vector.load %arg8[%c0_99, %c0_100, %c5, %c0_101, %c0_102] : memref<1x4x8x8x8xf32, #tpu.memory_space<vmem>>, vector<1x4x1x8x8xf32>
    %165 = vector.shape_cast %164 : vector<1x4x1x8x8xf32> to vector<4x8x8xf32>
    %166 = vector.broadcast %163 : vector<1x8x8xf32> to vector<4x8x8xf32>
    %167 = arith.mulf %165, %166 : vector<4x8x8xf32>
    %c0_103 = arith.constant 0 : index
    %c0_104 = arith.constant 0 : index
    %c5_105 = arith.constant 5 : index
    %c0_106 = arith.constant 0 : index
    %c0_107 = arith.constant 0 : index
    %168 = vector.load %arg9[%c0_103, %c0_104, %c5_105, %c0_106, %c0_107] : memref<1x4x8x8x8xf32, #tpu.memory_space<vmem>>, vector<1x4x1x8x8xf32>
    %169 = vector.shape_cast %168 : vector<1x4x1x8x8xf32> to vector<4x8x8xf32>
    %170 = vector.shape_cast %167 : vector<4x8x8xf32> to vector<1x4x1x8x8xf32>
    tpu.vector_store %arg9[%c0_103, %c0_104, %c5_105, %c0_106, %c0_107], %170 {strides = array<i32>} : memref<1x4x8x8x8xf32, #tpu.memory_space<vmem>>, vector<1x4x1x8x8xf32>,
    %c8_i32_108 = arith.constant 8 : i32
    %171 = arith.muli %arg2, %c8_i32_108 : i32
    %c6_i32 = arith.constant 6 : i32
    %172 = arith.addi %171, %c6_i32 : i32
    %173 = arith.index_cast %172 : i32 to index
    %174 = memref.load %arg3[%173] : memref<8xi32, #tpu.memory_space<smem>>
    %c1_i32_109 = arith.constant 1 : i32
    %175 = arith.addi %174, %c1_i32_109 : i32
    %c3_i32_110 = arith.constant 3 : i32
    %176 = arith.minsi %175, %c3_i32_110 : i32
    %177 = arith.index_cast %172 : i32 to index
    %c0_111 = arith.constant 0 : index
    %178 = vector.load %arg7[%177, %c0_111] : memref<8x1xf32, #tpu.memory_space<vmem>>, vector<1x1xf32>
    %179 = arith.index_cast %174 : i32 to index
    %c0_112 = arith.constant 0 : index
    %c0_113 = arith.constant 0 : index
    %180 = vector.load %arg10[%179, %c0_112, %c0_113] : memref<4x8x8xf32, #tpu.memory_space<vmem>>, vector<1x8x8xf32>
    %181 = arith.index_cast %176 : i32 to index
    %c0_114 = arith.constant 0 : index
    %c0_115 = arith.constant 0 : index
    %182 = vector.load %arg10[%181, %c0_114, %c0_115] : memref<4x8x8xf32, #tpu.memory_space<vmem>>, vector<1x8x8xf32>
    %cst_116 = arith.constant 1.000000e+00 : f32
    %183 = vector.broadcast %cst_116 : f32 to vector<1x1xf32>
    %184 = arith.subf %183, %178 : vector<1x1xf32>
    %185 = vector.shape_cast %184 : vector<1x1xf32> to vector<1x1x1xf32>
    %186 = vector.broadcast %185 : vector<1x1x1xf32> to vector<1x8x8xf32>
    %187 = arith.mulf %180, %186 : vector<1x8x8xf32>
    %188 = vector.shape_cast %178 : vector<1x1xf32> to vector<1x1x1xf32>
    %189 = vector.broadcast %188 : vector<1x1x1xf32> to vector<1x8x8xf32>
    %190 = arith.mulf %182, %189 : vector<1x8x8xf32>
    %191 = arith.addf %187, %190 : vector<1x8x8xf32>
    %c0_117 = arith.constant 0 : index
    %c0_118 = arith.constant 0 : index
    %c6 = arith.constant 6 : index
    %c0_119 = arith.constant 0 : index
    %c0_120 = arith.constant 0 : index
    %192 = vector.load %arg8[%c0_117, %c0_118, %c6, %c0_119, %c0_120] : memref<1x4x8x8x8xf32, #tpu.memory_space<vmem>>, vector<1x4x1x8x8xf32>
    %193 = vector.shape_cast %192 : vector<1x4x1x8x8xf32> to vector<4x8x8xf32>
    %194 = vector.broadcast %191 : vector<1x8x8xf32> to vector<4x8x8xf32>
    %195 = arith.mulf %193, %194 : vector<4x8x8xf32>
    %c0_121 = arith.constant 0 : index
    %c0_122 = arith.constant 0 : index
    %c6_123 = arith.constant 6 : index
    %c0_124 = arith.constant 0 : index
    %c0_125 = arith.constant 0 : index
    %196 = vector.load %arg9[%c0_121, %c0_122, %c6_123, %c0_124, %c0_125] : memref<1x4x8x8x8xf32, #tpu.memory_space<vmem>>, vector<1x4x1x8x8xf32>
    %197 = vector.shape_cast %196 : vector<1x4x1x8x8xf32> to vector<4x8x8xf32>
    %198 = vector.shape_cast %195 : vector<4x8x8xf32> to vector<1x4x1x8x8xf32>
    tpu.vector_store %arg9[%c0_121, %c0_122, %c6_123, %c0_124, %c0_125], %198 {strides = array<i32>} : memref<1x4x8x8x8xf32, #tpu.memory_space<vmem>>, vector<1x4x1x8x8xf32>,
    %c8_i32_126 = arith.constant 8 : i32
    %199 = arith.muli %arg2, %c8_i32_126 : i32
    %c7_i32 = arith.constant 7 : i32
    %200 = arith.addi %199, %c7_i32 : i32
    %201 = arith.index_cast %200 : i32 to index
    %202 = memref.load %arg3[%201] : memref<8xi32, #tpu.memory_space<smem>>
    %c1_i32_127 = arith.constant 1 : i32
    %203 = arith.addi %202, %c1_i32_127 : i32
    %c3_i32_128 = arith.constant 3 : i32
    %204 = arith.minsi %203, %c3_i32_128 : i32
    %205 = arith.index_cast %200 : i32 to index
    %c0_129 = arith.constant 0 : index
    %206 = vector.load %arg7[%205, %c0_129] : memref<8x1xf32, #tpu.memory_space<vmem>>, vector<1x1xf32>
    %207 = arith.index_cast %202 : i32 to index
    %c0_130 = arith.constant 0 : index
    %c0_131 = arith.constant 0 : index
    %208 = vector.load %arg10[%207, %c0_130, %c0_131] : memref<4x8x8xf32, #tpu.memory_space<vmem>>, vector<1x8x8xf32>
    %209 = arith.index_cast %204 : i32 to index
    %c0_132 = arith.constant 0 : index
    %c0_133 = arith.constant 0 : index
    %210 = vector.load %arg10[%209, %c0_132, %c0_133] : memref<4x8x8xf32, #tpu.memory_space<vmem>>, vector<1x8x8xf32>
    %cst_134 = arith.constant 1.000000e+00 : f32
    %211 = vector.broadcast %cst_134 : f32 to vector<1x1xf32>
    %212 = arith.subf %211, %206 : vector<1x1xf32>
    %213 = vector.shape_cast %212 : vector<1x1xf32> to vector<1x1x1xf32>
    %214 = vector.broadcast %213 : vector<1x1x1xf32> to vector<1x8x8xf32>
    %215 = arith.mulf %208, %214 : vector<1x8x8xf32>
    %216 = vector.shape_cast %206 : vector<1x1xf32> to vector<1x1x1xf32>
    %217 = vector.broadcast %216 : vector<1x1x1xf32> to vector<1x8x8xf32>
    %218 = arith.mulf %210, %217 : vector<1x8x8xf32>
    %219 = arith.addf %215, %218 : vector<1x8x8xf32>
    %c0_135 = arith.constant 0 : index
    %c0_136 = arith.constant 0 : index
    %c7 = arith.constant 7 : index
    %c0_137 = arith.constant 0 : index
    %c0_138 = arith.constant 0 : index
    %220 = vector.load %arg8[%c0_135, %c0_136, %c7, %c0_137, %c0_138] : memref<1x4x8x8x8xf32, #tpu.memory_space<vmem>>, vector<1x4x1x8x8xf32>
    %221 = vector.shape_cast %220 : vector<1x4x1x8x8xf32> to vector<4x8x8xf32>
    %222 = vector.broadcast %219 : vector<1x8x8xf32> to vector<4x8x8xf32>
    %223 = arith.mulf %221, %222 : vector<4x8x8xf32>
    %c0_139 = arith.constant 0 : index
    %c0_140 = arith.constant 0 : index
    %c7_141 = arith.constant 7 : index
    %c0_142 = arith.constant 0 : index
    %c0_143 = arith.constant 0 : index
    %224 = vector.load %arg9[%c0_139, %c0_140, %c7_141, %c0_142, %c0_143] : memref<1x4x8x8x8xf32, #tpu.memory_space<vmem>>, vector<1x4x1x8x8xf32>
    %225 = vector.shape_cast %224 : vector<1x4x1x8x8xf32> to vector<4x8x8xf32>
    %226 = vector.shape_cast %223 : vector<4x8x8xf32> to vector<1x4x1x8x8xf32>
    tpu.vector_store %arg9[%c0_139, %c0_140, %c7_141, %c0_142, %c0_143], %226 {strides = array<i32>} : memref<1x4x8x8x8xf32, #tpu.memory_space<vmem>>, vector<1x4x1x8x8xf32>,
    return
  }
  func.func @transform_0(%arg0: i32, %arg1: i32, %arg2: i32, %arg3: memref<8xi32, #tpu.memory_space<smem>>) -> (i32, i32, i32) {
    %c0_i32 = arith.constant 0 : i32
    %c0_i32_0 = arith.constant 0 : i32
    %c0_i32_1 = arith.constant 0 : i32
    return %arg0, %c0_i32, %c0_i32_0 : i32, i32, i32
  }
  func.func @transform_1(%arg0: i32, %arg1: i32, %arg2: i32, %arg3: memref<8xi32, #tpu.memory_space<smem>>) -> (i32, i32) {
    %c0_i32 = arith.constant 0 : i32
    %c0_i32_0 = arith.constant 0 : i32
    %c0_i32_1 = arith.constant 0 : i32
    return %c0_i32, %c0_i32_0 : i32, i32
  }
  func.func @transform_2(%arg0: i32, %arg1: i32, %arg2: i32, %arg3: memref<8xi32, #tpu.memory_space<smem>>) -> (i32, i32) {
    %c0_i32 = arith.constant 0 : i32
    %c0_i32_0 = arith.constant 0 : i32
    %c0_i32_1 = arith.constant 0 : i32
    return %c0_i32, %c0_i32_0 : i32, i32
  }
  func.func @transform_3(%arg0: i32, %arg1: i32, %arg2: i32, %arg3: memref<8xi32, #tpu.memory_space<smem>>) -> (i32, i32) {
    %c0_i32 = arith.constant 0 : i32
    %c0_i32_0 = arith.constant 0 : i32
    %c0_i32_1 = arith.constant 0 : i32
    return %c0_i32, %c0_i32_0 : i32, i32
  }
  func.func @transform_4(%arg0: i32, %arg1: i32, %arg2: i32, %arg3: memref<8xi32, #tpu.memory_space<smem>>) -> (i32, i32, i32, i32, i32) {
    %c0_i32 = arith.constant 0 : i32
    %c0_i32_0 = arith.constant 0 : i32
    %c0_i32_1 = arith.constant 0 : i32
    return %arg0, %arg1, %arg2, %c0_i32, %c0_i32_0 : i32, i32, i32, i32, i32
  }
  func.func @transform_5(%arg0: i32, %arg1: i32, %arg2: i32, %arg3: memref<8xi32, #tpu.memory_space<smem>>) -> (i32, i32, i32, i32, i32) {
    %c0_i32 = arith.constant 0 : i32
    %c0_i32_0 = arith.constant 0 : i32
    %c0_i32_1 = arith.constant 0 : i32
    return %arg0, %arg1, %arg2, %c0_i32, %c0_i32_0 : i32, i32, i32, i32, i32
  }
}

</mosaic_0001>

<bundles_post_ra>
// kernel: attention_gate_forward.2
= control target key start
LH: loop header
LB: loop body
LE: loop exit
PB: predicated region body
PF: predicated region fallthrough
CT: control target
= control target key end

     0   :  { %s607_s18 = smov 0   ;;  %s648_s0 = inlined_call_operand.vmem [shape: f32[2,8,64], index: 0, kind: input, shape index: {}]   ;;  %s649_s1 = inlined_call_operand.vmem [shape: f32[2,4,64], index: 1, kind: input, shape index: {}]   ;;  %s650_s2 = inlined_call_operand.vmem [shape: f32[8,8], index: 2, kind: input, shape index: {}]   ;;  %s651_s3 = inlined_call_operand.vmem [shape: f32[8,4], index: 3, kind: input, shape index: {}]   ;;  %s652_s4 = inlined_call_operand.vmem [shape: f32[8,1], index: 4, kind: input, shape index: {}]   ;;  %s653_s5 = inlined_call_operand.vmem [shape: f32[2,1,64], index: 5, kind: output, shape index: {}]  }
   0x1 LB: > { %s517_s19 = sadd.s32 4294967295, %s572_s18   ;;  %p521_p0 = scmp.ge.s32.totalorder %s572_s18, 1  ;;  %s572_s18 = sphi %s607_s18, %s15_s18  }
   0x2   : > { %p195_p1 = scmp.lt.s32.totalorder %s572_s18, 3 }
   0x4   : > { %p196_p2 = pnand %p521_p0, %p195_p1 }
   0x5   : > { %p224_p3 = scmp.lt.s32.totalorder (!%p196_p2), %s517_s19, 1 }
   0x6   : > { %199 = sbr.rel (%p196_p2) target bundleno = 874 (0x36a), region = 40 }
   0xb   : > { %v574_v0 = vmov 0.0   ;;  %vm575_vm0 = vmmov 0   ;;  %s655_s19 = smov (!%p224_p3, %s517_s19), 1  ;;  %v237_v1 = vld [vmem:[%s650_s2] sm:$0xff]  ;;  %vm240_vm1 = vcmask 64512   ;;  %vm333_vm2 = vcmask 1043456  }
   0xc   : > { %534 = vmatprep.subr.mxu0 %v574_v0  ;;  %536 = vmatprep.mubr.msk.f32.mxu0 %vm575_vm0, %v574_v0  ;;  %s522_s20 = sshll.u32 %s655_s19, 3  ;;  %s523_s26 = sshll.u32 %s655_s19, 2  ;;  %v238_v3 = vld [vmem:[%s651_s3] sm:$0xff]  ;;  %vm329_vm3 = vcmask 31744   ;;  %vm314_vm4 = vcmask 523264   ;;  %v576_v11 = vmov 0  }
   0xd   : > { %539 = vmatprep.subr.mxu1 %v574_v0  ;;  %541 = vmatprep.mubr.msk.f32.mxu1 %vm575_vm0, %v574_v0  ;;  %s227_s23 = scalar_lea.vmem %s648_s0, %s522_s20  ;;  %s231_s29 = scalar_lea.vmem %s649_s1, %s523_s26  ;;  %v239_v12 = vld [vmem:[%s652_s4] sm:$0xff]  ;;  %vm456_vm6 = vcmask 516096  }
   0xe   : > { %v235_v2 = vld [vmem:[%s227_s23] sm:$0xff]  ;;  %555 = vset.pattern.permute.xlu0 %v576_v11  ;;  %s234_s11 = scalar_lea.vmem %s653_s5, %s655_s19 }
   0xf   : > { %535 = vmatpush3.msra.mxu0 %v235_v2  ;;  %v236_v4 = vld [vmem:[%s231_s29] sm:$0xf] }
  0x10   : > { %537 = vmatmul.mubr.msk.f32.vlgmr.msra.gmra.mxu0 %vm240_vm1, %v237_v1  ;;  %540 = vmatpush3.msk.msra.mxu1 %vm333_vm2, %v236_v4 }
  0x11   : > { %542 = vmatmul.mubr.msk.f32.vlgmr.msra.gmra.mxu1 %vm329_vm3, %v238_v3 }
  0xd0   : > { %v310_v5 = vpop.f32.mrf.mxu0 }
  0xd1   : > { %v403_v6 = vpop.f32.mrf.mxu1  ;;  %v315_v7 = vsel %vm314_vm4, %v310_v5, 0.0 }
  0xd2   : > { %316 = vadd.xlane.f32.xlu0 %v315_v7  ;;  %v538_v8 = vpop.f32.mrf.mxu0  ;;  %v407_v10 = vsel %vm314_vm4, %v403_v6, 0.0 }
  0xd3   : > { %v543_v9 = vpop.f32.mrf.mxu1 }
  0xd6   : > { %408 = vadd.xlane.f32.xlu0 %v407_v10 }
  0xec   : > { %426 = vperm.xlu0 %555, %v239_v12  }
 0x15b   : > { %v317_v13 = vpop.xlane.xlu0 %316 }
 0x15c   : > { %v319_v14 = vmul.f32 0.015625, %v317_v13 }
 0x15e   : > { %v320_v15 = vsub.f32 %v310_v5, %v319_v14 }
 0x15f   : > { %v409_v16 = vpop.xlane.xlu0 %408 }
 0x160   : > { %v410_v17 = vmul.f32 0.015625, %v409_v16  ;;  %v321_v18 = vmul.f32 %v320_v15, %v320_v15 }
 0x162   : > { %v411_v19 = vsub.f32 %v403_v6, %v410_v17  ;;  %v322_v20 = vsel %vm314_vm4, %v321_v18, 0.0 }
 0x163   : > { %323 = vadd.xlane.f32.xlu1 %v322_v20 }
 0x164   : > { %v412_v21 = vmul.f32 %v411_v19, %v411_v19 }
 0x166   : > { %v413_v22 = vsel %vm314_vm4, %v412_v21, 0.0 }
 0x167   : > { %414 = vadd.xlane.f32.xlu1 %v413_v22  ;;  %v427_v35 = vpop.permute.xlu0 %426 }
 0x1ec   : > { %v324_v23 = vpop.xlane.xlu1 %323 }
 0x1ed   : > { %v325_v24 = vmul.f32 0.015625, %v324_v23 }
 0x1ef   : > { %v326_v25 = vadd.f32 1e-05, %v325_v24 }
 0x1f0   : > { %v415_v26 = vpop.xlane.xlu1 %414 }
 0x1f1   : > { %v416_v27 = vmul.f32 0.015625, %v415_v26  ;;  %556 = vrsqrt.f32 %v326_v25 }
 0x1f3   : > { %v417_v28 = vadd.f32 1e-05, %v416_v27 }
 0x1f5   : > { %558 = vrsqrt.f32 %v417_v28 }
 0x1fe   : > { %v557_v29 = vpop.eup %556 }
 0x1ff   : > { %v328_v31 = vmul.f32 %v557_v29, %v320_v15 }
 0x202   : > { %v559_v30 = vpop.eup %558 }
 0x203   : > { %v419_v32 = vmul.f32 %v559_v30, %v411_v19 }
 0x205   : > { %v420_v33 = vadd.f32 %v419_v32, %v328_v31 }
 0x207   : > { %vm421_vm5 = vcmp.ge.f32.partialorder %v420_v33, 0.0  ;;  %v422_v34 = vmul.f32 0.01, %v420_v33 }
 0x209   : > { %v423_v36 = vsel %vm421_vm5, %v420_v33, %v422_v34 }
 0x20a   : > { %v429_v37 = vmul.f32 %v427_v35, %v423_v36 }
 0x20c   : > { %v430_v38 = vsel %vm314_vm4, %v429_v37, 0.0 }
 0x20d   : > { %v431_v39 = vrot.slane %v430_v38, 4 }
 0x20f   : > { %v432_v40 = vadd.f32 %v431_v39, %v430_v38 }
 0x211   : > { %v433_v41 = vrot.slane %v432_v40, 2 }
 0x213   : > { %v434_v42 = vadd.f32 %v433_v41, %v432_v40 }
 0x215   : > { %v435_v43 = vrot.slane %v434_v42, 1 }
 0x217   : > { %v436_v44 = vadd.f32 %v435_v43, %v434_v42 }
 0x219   : > { %v437_v45 = vsel %vm314_vm4, %v436_v44, 0.0 }
 0x21a   : > { %438 = vadd.xlane.f32.xlu1 %v437_v45 }
 0x2a3   : > { %v439_v46 = vpop.xlane.xlu1 %438 }
 0x2a4   : > { %v440_v47 = vmul.f32 0.015625, %v439_v46 }
 0x2a6   : > { %v441_v48 = vsub.f32 %v436_v44, %v440_v47 }
 0x2a8   : > { %v442_v49 = vmul.f32 %v441_v48, %v441_v48 }
 0x2aa   : > { %v443_v50 = vsel %vm314_vm4, %v442_v49, 0.0 }
 0x2ab   : > { %444 = vadd.xlane.f32.xlu1 %v443_v50 }
 0x334   : > { %v445_v51 = vpop.xlane.xlu1 %444 }
 0x335   : > { %v446_v52 = vmul.f32 0.015625, %v445_v51 }
 0x337   : > { %v447_v53 = vadd.f32 1e-05, %v446_v52 }
 0x339   : > { %560 = vrsqrt.f32 %v447_v53 }
 0x346   : > { %v561_v54 = vpop.eup %560 }
 0x347   : > { %v449_v55 = vmul.f32 %v561_v54, %v441_v48 }
 0x349   : > { %v527_v56 = vmul.f32 -1.442695, %v449_v55 }
 0x34b   : > { %562 = vpow2.f32 %v527_v56 }
 0x358   : > { %v563_v57 = vpop.eup %562 }
 0x359   : > { %v453_v58 = vadd.f32 1.0, %v563_v57 }
 0x35b   : > { %564 = vrcp.f32 %v453_v58 }
 0x368   : > { %v565_v59 = vpop.eup %564 }
 0x369   : > { %457 = vst.msk [vmem:[%s234_s11] sm:$0x1] %vm456_vm6, %v565_v59 }
 0x36a PF: > { %s15_s18 = sadd.s32 1, %s572_s18  }
 0x36b   : > { %p12_p4 = scmp.ge.s32.totalorder %s15_s18, 4  }
 0x36d   :  { %14 = sbr.rel (!%p12_p4) target bundleno = 1 (0x1), region = 73 }

// kernel: attention_gate_forward.3
= control target key start
LH: loop header
LB: loop body
LE: loop exit
PB: predicated region body
PF: predicated region fallthrough
CT: control target
= control target key end

     0   :  { %s2001_s0 = inlined_call_operand.vmem [shape: s32[8], index: 0, kind: input, shape index: {}]   ;;  %s2002_s1 = inlined_call_operand.vmem [shape: f32[2,16,4], index: 1, kind: input, shape index: {}]   ;;  %s2003_s2 = inlined_call_operand.vmem [shape: f32[4,8], index: 2, kind: input, shape index: {}]   ;;  %s2004_s3 = inlined_call_operand.vmem [shape: f32[8,4], index: 3, kind: input, shape index: {}]   ;;  %s2005_s4 = inlined_call_operand.vmem [shape: f32[8,1], index: 4, kind: input, shape index: {}]   ;;  %s2006_s5 = inlined_call_operand.vmem [shape: f32[2,4,8,8,8], index: 5, kind: input, shape index: {}]   ;;  %s2007_s6 = inlined_call_operand.hbm [shape: f32[2,4,8,8,8], index: 6, kind: output, shape index: {}]  }
   0x1   :  { %2022 = sst [smem:[#allocation21_spill]] %s2002_s1  ;;  %s11_s23 = sshll.u32 %s2001_s0, 4  ;;  %s12_s23 = int_to_ptr.vmem [resolvable:$true] %s11_s23 }
   0x2   :  { %2023 = sst [smem:[#allocation22_spill]] %s2003_s2  ;;  %s1437_s24 = scalar_lea.vmem %s12_s23, 16 }
   0x3   :  { %2024 = sst [smem:[#allocation23_spill]] %s2004_s3  ;;  %p1438_p0 = scmp.ne.s32.totalorder %s12_s23, %s1437_s24 }
   0x4   :  { %2025 = sst [smem:[#allocation24_spill]] %s2005_s4  ;;  %p1442_p1 = scmp.lt.s32.totalorder %s12_s23, %s12_s23 }
   0x5   :  { %2026 = sst [smem:[#allocation25_spill]] %s2006_s5  ;;  %p1443_p2 = scmp.lt.s32.totalorder %s1437_s24, %s1437_s24 }
   0x6   :  { %2027 = sst [smem:[#allocation26_spill]] %s2007_s6 }
   0x7   :  { %p1444_p3 = por %p1443_p2, %p1442_p1 }
   0x9   :  { %p1445_p4 = pnand %p1444_p3, %p1438_p0 }
   0xb   :  { %1448 = shalt.err (!%p1445_p4)  }
   0xc   :  { %s1529_s25 = smov [#allocation4]  }
   0xd   :  { %14 = dma.vmem_to_smem %s12_s23, 16, %s1529_s25, [#allocation3] }
   0xe   :  { %1499 = dma.done.wait [#allocation3], 16 }
   0xf   :  { %1500 = vsyncadd [#allocation3], 4294967280 }
  0x10   :  { %16 = sfence }
  0x11   :  { %17 = vsyncpa [#allocation6], 0 }
  0x12   :  { %19 = vsyncpa [#allocation6 + $0x1], 0  ;;  %s1573_s26 = smov 0   ;;  %s1575_s27 = smov 0  }
  0x13   :  { %s1577_s0 = smov 0   ;;  %s1579_s28 = smov 0  }
  0x14   :  { %s1581_s29 = smov 0   ;;  %s1583_s30 = smov 0  }
  0x15 LB: > { %2028 = sst [smem:[#allocation9_spill]] %s1507_s26  ;;  %s1194_s7 = sadd.s32 4294967295, %s1527_s30   ;;  %s1527_s30 = sphi %s1583_s30, %s25_s30   ;;  %s1523_s29 = sphi %s1581_s29, %s2074_s29   ;;  %s1519_s28 = sphi %s1579_s28, %s2073_s28   ;;  %s1515_s0 = sphi %s1577_s0, %s2072_s0   ;;  %s1511_s27 = sphi %s1575_s27, %s2076_s27   ;;  %s1507_s26 = sphi %s1573_s26, %s2075_s26  }
  0x16   : > { %2029 = sst [smem:[#allocation10_spill]] %s1515_s0  ;;  %s1195_s8 = sadd.s32 4294967294, %s1527_s30  }
  0x17   : > { %2030 = sst [smem:[#allocation11_spill]] %s1519_s28  ;;  %s44_s9 = sadd.s32 1, %s1523_s29 }
  0x18   : > { %2031 = sst [smem:[#allocation12_spill]] %s1523_s29  ;;  %s174_s10 = sadd.s32 1, %s1515_s0 }
  0x19   : > { %2032 = sst [smem:[#allocation13_spill]] %s1527_s30  ;;  %p46_p5 = scmp.ge.s32.totalorder %s44_s9, 2 }
  0x1a   : > { %p184_p6 = scmp.ne.s32.totalorder %s1515_s0, %s1511_s27  ;;  %p185_p7 = scmp.eq.s32.totalorder %s1194_s7, 1 }
  0x1b   : > { %p190_p8 = scmp.ne.s32.totalorder %s1511_s27, %s1507_s26  ;;  %s2078_s9 = smov (%p46_p5, %s44_s9), 0 }
  0x1c   : > { %2033 = sst [smem:[#allocation14_spill]] %s2078_s9  ;;  %p1613_p9 = por %p185_p7, %p184_p6 }
  0x1d   : > { %p191_p10 = scmp.eq.s32.totalorder %s1195_s8, 1  ;;  %s167_s12 = ssub.s32 %s1523_s29, %s2078_s9 }
  0x1e   : > { %s2034_s11 = scalar_select %p1613_p9, 1, 0 }
  0x1f   : > { %p1198_p11 = scmp.ge.s32.totalorder %s1527_s30, 1  ;;  %p172_p12 = scmp.eq.s32.totalorder %s167_s12, 0 }
  0x20   : > { %2035 = sst [smem:[#allocation15_spill]] %s2034_s11  ;;  %p1620_p13 = por %p191_p10, %p190_p8 }
  0x21   : > { %p245_p0 = scmp.lt.s32.totalorder %s1527_s30, 3 }
  0x22   : > { %s2036_s13 = scalar_select %p1620_p13, 1, 0 }
  0x23   : > { %s1626_s14 = scalar_select %p172_p12, %s1515_s0, %s174_s10  }
  0x24   : > { %2037 = sst [smem:[#allocation16_spill]] %s2036_s13  ;;  %p246_p1 = pnand %p1198_p11, %p245_p0 }
  0x25   : > { %2038 = sst [smem:[#allocation17_spill]] %s1626_s14 }
  0x26   : > { %249 = sbr.rel (%p246_p1) target bundleno = 496 (0x1f0), region = 40 }
  0x2b   : > { %s2039_s2 = sld [smem:[#allocation22_spill]]  ;;  %vm324_vm0 = vcmask 1043456   ;;  %p287_p2 = scmp.lt.s32.totalorder %s1519_s28, 1  ;;  %vm317_vm1 = vcmask 31744   ;;  %v1530_v3 = vmov 0.0   ;;  %vm1531_vm2 = vmmov 0  }
  0x2c   : > { %s2040_s1 = sld [smem:[#allocation21_spill]]  ;;  %1325 = vmatprep.subr.mxu1 %v1530_v3  ;;  %1327 = vmatprep.mubr.msk.f32.mxu1 %vm1531_vm2, %v1530_v3  ;;  %vm480_vm3 = vcmask 64512  }
  0x2d   : > { %s1635_s17 = scalar_select %p287_p2, %s1519_s28, 1 }
  0x2e   : > { %s2041_s4 = sld [smem:[#allocation24_spill]] }
  0x2f   : > { %s1306_s18 = sshll.u32 %s1635_s17, 4  ;;  %s2042_s3 = sld [smem:[#allocation23_spill]] }
  0x30   : > { %s1682_s7 = sld [smem:[#allocation4]]  ;;  %s1307_s12 = sshll.u32 %s1635_s17, 8 }
  0x31   : > { %v316_v0 = vld [vmem:[%s2039_s2] sm:$0xf]  ;;  %s1684_s8 = sld [smem:[#allocation4 + $0x1]] }
  0x32   : > { %1320 = vmatprep.subr.msk.mxu0 %vm324_vm0, %v316_v0  ;;  %s291_s21 = scalar_lea.vmem %s2040_s1, %s1306_s18  ;;  %s1688_s15 = sld [smem:[#allocation4 + $0x2]] }
  0x33   : > { %1321 = vmatpush3.msk.msra.mxu0 %vm324_vm0, %v316_v0  ;;  %v314_v1 = vld [vmem:[%s291_s21] sm:$0xff]  ;;  %v315_v2 = vld [vmem:[%s291_s21 + $0x8] sm:$0xff]  ;;  %s2043_s5 = sld [smem:[#allocation25_spill]] }
  0x34   : > { %1322 = vmatprep.mubr.msk.f32.mxu0 %vm317_vm1, %v314_v1  ;;  %1330 = vmatprep.subr.mxu0 %v1530_v3  ;;  %v713_v4 = vld [vmem:[%s2041_s4] sm:$0x1]  ;;  %v1218_v5 = vld [vmem:[%s2041_s4 + $0x1] sm:$0x1]  ;;  %v1230_v6 = vld [vmem:[%s2041_s4 + $0x2] sm:$0x1] }
  0x35   : > { %1323 = vmatmul.mubr.msk.f32.vlgmr.msra.gmra.mxu0 %vm317_vm1, %v315_v2  ;;  %v720_v7 = vsub.f32 1.0, %v713_v4  ;;  %v758_v8 = vsub.f32 1.0, %v1218_v5  ;;  %v1242_v9 = vld [vmem:[%s2041_s4 + $0x3] sm:$0x1]  ;;  %v797_v10 = vsub.f32 1.0, %v1230_v6  ;;  %s1695_s20 = sld [smem:[#allocation4 + $0x3]] }
  0x36   : > { %1332 = vmatprep.mubr.msk.f32.mxu0 %vm1531_vm2, %v1530_v3  ;;  %v1254_v11 = vld [vmem:[%s2041_s4 + $0x4] sm:$0x1]  ;;  %v836_v12 = vsub.f32 1.0, %v1242_v9  ;;  %v1266_v13 = vld [vmem:[%s2041_s4 + $0x5] sm:$0x1]  ;;  %s709_s10 = sadd.s32 1, %s1682_s7 }
  0x37   : > { %1345 = vpush %v720_v7  ;;  %v875_v14 = vsub.f32 1.0, %v1254_v11  ;;  %v1278_v15 = vld [vmem:[%s2041_s4 + $0x6] sm:$0x1]  ;;  %v914_v16 = vsub.f32 1.0, %v1266_v13  ;;  %v1290_v17 = vld [vmem:[%s2041_s4 + $0x7] sm:$0x1] }
  0x38   : > { %1347 = vpush %v713_v4  ;;  %v953_v18 = vsub.f32 1.0, %v1278_v15  ;;  %v992_v19 = vsub.f32 1.0, %v1290_v17  ;;  %v403_v21 = vld [vmem:[%s2042_s3] sm:$0xff]  ;;  %p710_p3 = scmp.lt.s32.totalorder %s709_s10, 3  ;;  %s747_s22 = sadd.s32 1, %s1684_s8 }
  0x39   : > { %1349 = vpush %v758_v8  ;;  %s1693_s19 = scalar_lea.vmem %s2043_s5, %s1307_s12  ;;  %s1703_s17 = sld [smem:[#allocation4 + $0x4]] }
  0x3a   : > { %1351 = vpush %v1218_v5  ;;  %s2080_s10 = smov (!%p710_p3, %s709_s10), 3  ;;  %p748_p4 = scmp.lt.s32.totalorder %s747_s22, 3  ;;  %v732_v48 = vld [vmem:[%s1693_s19] sm:$0xff]  ;;  %v1221_v58 = vld [vmem:[%s1693_s19 + $0x8] sm:$0xff] }
  0x3b   : > { %1353 = vpush %v797_v10  ;;  %s1705_s24 = sld [smem:[#allocation4 + $0x5]]  ;;  %s786_s16 = sadd.s32 1, %s1688_s15  ;;  %v733_v49 = vld [vmem:[%s1693_s19 + $0x40] sm:$0xff]  ;;  %v1222_v59 = vld [vmem:[%s1693_s19 + $0x48] sm:$0xff] }
  0x3c   : > { %1355 = vpush %v1230_v6  ;;  %s2082_s22 = smov (!%p748_p4, %s747_s22), 3  ;;  %s825_s4 = sadd.s32 1, %s1695_s20  ;;  %v734_v50 = vld [vmem:[%s1693_s19 + $0x80] sm:$0xff]  ;;  %v1223_v60 = vld [vmem:[%s1693_s19 + $0x88] sm:$0xff] }
  0x3d   : > { %1357 = vpush %v836_v12  ;;  %p787_p5 = scmp.lt.s32.totalorder %s786_s16, 3  ;;  %p826_p6 = scmp.lt.s32.totalorder %s825_s4, 3  ;;  %v735_v51 = vld [vmem:[%s1693_s19 + $0xc0] sm:$0xff]  ;;  %v1224_v61 = vld [vmem:[%s1693_s19 + $0xc8] sm:$0xff] }
  0x3e   : > { %1359 = vpush %v1242_v9  ;;  %s1736_s0 = sld [smem:[#allocation4 + $0x6]]  ;;  %v1233_v9 = vld [vmem:[%s1693_s19 + $0x10] sm:$0xff] }
  0x3f   : > { %1361 = vpush %v875_v14  ;;  %2044 = sst [smem:[#allocation18_spill]] %s1703_s17  ;;  %s2084_s16 = smov (!%p787_p5, %s786_s16), 3 }
  0x40   : > { %1363 = vpush %v1254_v11  ;;  %s2086_s4 = smov (!%p826_p6, %s825_s4), 3  ;;  %s864_s2 = sadd.s32 1, %s1703_s17 }
  0x41   : > { %1365 = vpush %v914_v16  ;;  %2045 = sst [smem:[#allocation19_spill]] %s1705_s24  ;;  %p865_p7 = scmp.lt.s32.totalorder %s864_s2, 3 }
  0x42   : > { %1367 = vpush %v1266_v13  ;;  %2046 = sst [smem:[#allocation20_spill]] %s2086_s4  ;;  %s903_s6 = sadd.s32 1, %s1705_s24 }
  0x43   : > { %1369 = vpush %v953_v18  ;;  %s1739_s9 = sld [smem:[#allocation4 + $0x7]]  ;;  %s2088_s2 = smov (!%p865_p7, %s864_s2), 3  ;;  %v1235_v18 = vld [vmem:[%s1693_s19 + $0x90] sm:$0xff] }
  0x44   : > { %1371 = vpush %v1278_v15  ;;  %s942_s5 = sadd.s32 1, %s1736_s0  ;;  %p904_p8 = scmp.lt.s32.totalorder %s903_s6, 3 }
  0x45   : > { %1373 = vpush %v992_v19  ;;  %p943_p10 = scmp.lt.s32.totalorder %s942_s5, 3  ;;  %v1236_v19 = vld [vmem:[%s1693_s19 + $0xd0] sm:$0xff] }
  0x46   : > { %1375 = vpush %v1290_v17  ;;  %s2090_s6 = smov (!%p904_p8, %s903_s6), 3  ;;  %v1234_v17 = vld [vmem:[%s1693_s19 + $0x50] sm:$0xff] }
  0x47   : > { %s2092_s5 = smov (!%p943_p10, %s942_s5), 3  ;;  %s1268_s17 = sshll.u32 %s2090_s6, 3 }
  0x49   : > { %s981_s28 = sadd.s32 1, %s1739_s9 }
  0x4a   : > { %p982_p11 = scmp.lt.s32.totalorder %s981_s28, 3 }
  0x4c   : > { %s2094_s28 = smov (!%p982_p11, %s981_s28), 3 }
  0x68   : > { %s1701_s23 = spop %1345 }
  0x69   : > { %s1707_s25 = spop %1347  ;;  %v723_v33 = vstv %s1701_s23 }
  0x6a   : > { %s1712_s21 = spop %1349  ;;  %v728_v34 = vstv %s1707_s25 }
  0x6b   : > { %s1716_s1 = spop %1351  ;;  %v761_v35 = vstv %s1712_s21  ;;  %s2047_s21 = sshll.u32 %s1682_s7, 3 }
  0x6c   : > { %s1719_s3 = spop %1353  ;;  %v766_v36 = vstv %s1716_s1  ;;  %s1279_s1 = sshll.u32 %s1736_s0, 3 }
  0x6d   : > { %s1724_s12 = spop %1355  ;;  %v800_v37 = vstv %s1719_s3  ;;  %s715_s25 = scalar_lea.vmem [#allocation2], %s2047_s21 }
  0x6e   : > { %s1726_s18 = spop %1357  ;;  %v805_v38 = vstv %s1724_s12  ;;  %s1280_s7 = sshll.u32 %s2092_s5, 3 }
  0x6f   : > { %s1731_s14 = spop %1359  ;;  %v839_v39 = vstv %s1726_s18  ;;  %s2050_s12 = sand.u32 1, %s1511_s27  }
  0x70   : > { %s1742_s26 = spop %1361  ;;  %v844_v40 = vstv %s1731_s14  ;;  %s2048_s14 = sshll.u32 %s2080_s10, 3 }
  0x71   : > { %s1744_s30 = spop %1363  ;;  %v878_v41 = vstv %s1742_s26  ;;  %s718_s26 = scalar_lea.vmem [#allocation2], %s2048_s14 }
  0x72   : > { %s1747_s11 = spop %1365  ;;  %v883_v42 = vstv %s1744_s30  ;;  %s2049_s30 = sshll.u32 %s1684_s8, 3 }
  0x73   : > { %s1753_s13 = spop %1367  ;;  %v917_v43 = vstv %s1747_s11  ;;  %s753_s11 = scalar_lea.vmem [#allocation2], %s2049_s30 }
  0x74   : > { %s1758_s29 = spop %1369  ;;  %v922_v44 = vstv %s1753_s13  ;;  %s1807_s18 = sshll.u32 %s2050_s12, 8 }
  0x75   : > { %s1762_s4 = spop %1371  ;;  %v956_v45 = vstv %s1758_s29  ;;  %s2051_s21 = sshll.u32 %s2082_s22, 3 }
  0x76   : > { %s1768_s24 = spop %1373  ;;  %v961_v53 = vstv %s1762_s4  ;;  %s2052_s14 = sld [smem:[#allocation20_spill]] }
  0x77   : > { %s1784_s23 = spop %1375  ;;  %s2053_s8 = sld [smem:[#allocation18_spill]]  ;;  %v995_v0 = vstv %s1768_s24 }
  0x78   : > { %s2056_s22 = sld [smem:[#allocation19_spill]]  ;;  %v1000_v7 = vstv %s1784_s23  ;;  %s2067_s24 = sand.u32 1, %s1511_s27  }
  0x79   : > { %s2064_s4 = sld [smem:[#allocation11_spill]]  ;;  %s1956_s23 = scalar_lea.sflag [#allocation6], %s2067_s24 }
  0x7c   : > { %s2058_s10 = sshll.u32 %s2052_s14, 3 }
  0x7d   : > { %s834_s3 = scalar_lea.vmem [#allocation2], %s2058_s10 }
  0x7e   : > { %s2061_s14 = sshll.u32 %s2056_s22, 3 }
  0x7f   : > { %s909_s10 = scalar_lea.vmem [#allocation2], %s2061_s14  ;;  %s1308_s5 = sshll.u32 %s2064_s4, 12 }
  0xf5   : > { %v1324_v20 = vpop.f32.mrf.mxu0 }
  0xf6   : > { %v632_v24 = vrot.slane %v1324_v20, 4 }
  0xf7   : > { %v394_v22 = vpop.f32.mrf.mxu0 }
  0xf8   : > { %v482_v23 = vrot.slane %v394_v22, 4  ;;  %1326 = vmatpush3.msk.msra.mxu1 %vm324_vm0, %v394_v22 }
  0xf9   : > { %1335 = vmatprep.subr.mxu1 %v1530_v3  ;;  %1328 = vmatmul.mubr.msk.f32.vlgmr.msra.gmra.mxu1 %vm317_vm1, %v403_v21 }
  0xfa   : > { %1331 = vmatpush3.msk.msra.mxu0 %vm324_vm0, %v482_v23  ;;  %1336 = vmatpush3.msk.msra.mxu1 %vm324_vm0, %v1324_v20 }
  0xfb   : > { %1333 = vmatmul.mubr.msk.f32.vlgmr.msra.gmra.mxu0 %vm317_vm1, %v403_v21  ;;  %1340 = vmatprep.subr.mxu0 %v1530_v3 }
  0xfc   : > { %1341 = vmatpush3.msk.msra.mxu0 %vm324_vm0, %v632_v24  ;;  %1337 = vmatprep.mubr.msk.f32.mxu1 %vm1531_vm2, %v1530_v3 }
  0xfd   : > { %1342 = vmatprep.mubr.msk.f32.mxu0 %vm1531_vm2, %v1530_v3  ;;  %1338 = vmatmul.mubr.msk.f32.vlgmr.msra.gmra.mxu1 %vm317_vm1, %v403_v21 }
  0xff   : > { %1343 = vmatmul.mubr.msk.f32.vlgmr.msra.gmra.mxu0 %vm317_vm1, %v403_v21 }
 0x1b9   : > { %v476_v25 = vpop.f32.mrf.mxu1 }
 0x1ba   : > { %481 = vst.msk [vmem:[#allocation2] sm:$0xff] %vm480_vm3, %v476_v25 }
 0x1bb   : > { %v551_v26 = vpop.f32.mrf.mxu0  ;;  %v1329_v27 = vpop.f32.mrf.mxu1 }
 0x1bc   : > { %556 = vst.msk [vmem:[#allocation2 + $0x8] sm:$0xff] %vm480_vm3, %v551_v26  ;;  %v1245_v26 = vld [vmem:[%s1693_s19 + $0x18] sm:$0xff] }
 0x1bd   : > { %v1334_v28 = vpop.f32.mrf.mxu0  ;;  %v626_v29 = vpop.f32.mrf.mxu1  ;;  %v1246_v27 = vld [vmem:[%s1693_s19 + $0x58] sm:$0xff] }
 0x1be   : > { %631 = vst.msk [vmem:[#allocation2 + $0x10] sm:$0xff] %vm480_vm3, %v626_v29 }
 0x1bf   : > { %v701_v30 = vpop.f32.mrf.mxu0  ;;  %v1339_v31 = vpop.f32.mrf.mxu1 }
 0x1c0   : > { %706 = vst.msk [vmem:[#allocation2 + $0x18] sm:$0xff] %vm480_vm3, %v701_v30 }
 0x1c1   : > { %v1344_v32 = vpop.f32.mrf.mxu0 }
 0x1c7   : > { %v716_v46 = vld [vmem:[%s715_s25] sm:$0xff]  ;;  %s756_s25 = scalar_lea.vmem [#allocation2], %s2051_s21  ;;  %s2057_s21 = sshll.u32 %s1695_s20, 3 }
 0x1c8   : > { %v719_v47 = vld [vmem:[%s718_s26] sm:$0xff]  ;;  %v725_v54 = vmul.f32 %v723_v33, %v716_v46  ;;  %s2054_s26 = sshll.u32 %s1688_s15, 3  ;;  %s2059_s15 = sshll.u32 %s2053_s8, 3 }
 0x1c9   : > { %v754_v52 = vld [vmem:[%s753_s11] sm:$0xff]  ;;  %v730_v55 = vmul.f32 %v728_v34, %v719_v47  ;;  %s792_s30 = scalar_lea.vmem [#allocation2], %s2054_s26  ;;  %s2055_s11 = sshll.u32 %s2084_s16, 3 }
 0x1ca   : > { %v763_v56 = vmul.f32 %v761_v35, %v754_v52  ;;  %v757_v57 = vld [vmem:[%s756_s25] sm:$0xff]  ;;  %s795_s12 = scalar_lea.vmem [#allocation2], %s2055_s11  ;;  %s831_s25 = scalar_lea.vmem [#allocation2], %s2057_s21 }
 0x1cb   : > { %v793_v62 = vld [vmem:[%s792_s30] sm:$0xff]  ;;  %v768_v1 = vmul.f32 %v766_v36, %v757_v57  ;;  %s870_s26 = scalar_lea.vmem [#allocation2], %s2059_s15  ;;  %v731_v8 = vadd.f32 %v730_v55, %v725_v54  ;;  %s2060_s16 = sshll.u32 %s2088_s2, 3 }
 0x1cc   : > { %v796_v63 = vld [vmem:[%s795_s12] sm:$0xff]  ;;  %v802_v2 = vmul.f32 %v800_v37, %v793_v62  ;;  %s873_s20 = scalar_lea.vmem [#allocation2], %s2060_s16  ;;  %s912_s2 = scalar_lea.vmem [#allocation2], %s1268_s17 }
 0x1cd   : > { %v807_v3 = vmul.f32 %v805_v38, %v796_v63  ;;  %v832_v4 = vld [vmem:[%s831_s25] sm:$0xff]  ;;  %v769_v15 = vadd.f32 %v768_v1, %v763_v56  ;;  %v736_v22 = vmul.f32 %v732_v48, %v731_v8  ;;  %v737_v23 = vmul.f32 %v733_v49, %v731_v8  ;;  %s951_s8 = scalar_lea.vmem [#allocation2], %s1280_s7  ;;  %s2062_s30 = sshll.u32 %s1739_s9, 3  ;;  %v1272_v1 = vld [vmem:[%s1693_s19 + $0xe8] sm:$0xff] }
 0x1ce   : > { %v835_v5 = vld [vmem:[%s834_s3] sm:$0xff]  ;;  %v841_v10 = vmul.f32 %v839_v39, %v832_v4  ;;  %v738_v24 = vmul.f32 %v734_v50, %v731_v8  ;;  %v739_v25 = vmul.f32 %v735_v51, %v731_v8  ;;  %s948_s3 = scalar_lea.vmem [#allocation2], %s1279_s1  ;;  %s987_s11 = scalar_lea.vmem [#allocation2], %s2062_s30 }
 0x1cf   : > { %v871_v6 = vld [vmem:[%s870_s26] sm:$0xff]  ;;  %v846_v11 = vmul.f32 %v844_v40, %v835_v5  ;;  %v808_v16 = vadd.f32 %v807_v3, %v802_v2  ;;  %v775_v30 = vmul.f32 %v1221_v58, %v769_v15  ;;  %v776_v31 = vmul.f32 %v1222_v59, %v769_v15  ;;  %s2063_s12 = sshll.u32 %s2094_s28, 3  ;;  %s1850_s17 = scalar_lea.vmem [#allocation5], %s1807_s18  ;;  %v1269_v59 = vld [vmem:[%s1693_s19 + $0x28] sm:$0xff]  ;;  %v1281_v2 = vld [vmem:[%s1693_s19 + $0x30] sm:$0xff] }
 0x1d0   : > { %v880_v12 = vmul.f32 %v878_v41, %v871_v6  ;;  %v874_v13 = vld [vmem:[%s873_s20] sm:$0xff]  ;;  %v777_v32 = vmul.f32 %v1223_v60, %v769_v15  ;;  %v778_v33 = vmul.f32 %v1224_v61, %v769_v15  ;;  %s990_s6 = scalar_lea.vmem [#allocation2], %s2063_s12  ;;  %741 = vst.msk [vmem:[%s1850_s17] sm:$0xff] %vm480_vm3, %v736_v22  ;;  %742 = vst.msk [vmem:[%s1850_s17 + $0x40] sm:$0xff] %vm480_vm3, %v737_v23  ;;  %v1247_v41 = vld [vmem:[%s1693_s19 + $0x98] sm:$0xff]  ;;  %s1037_s0 = sshll.u32 %s1850_s17, 4  ;;  %s1928_s0 = int_to_ptr.vmem [resolvable:$true] %s1037_s0 }
 0x1d1   : > { %v910_v14 = vld [vmem:[%s909_s10] sm:$0xff]  ;;  %v885_v20 = vmul.f32 %v883_v42, %v874_v13  ;;  %743 = vst.msk [vmem:[%s1850_s17 + $0x80] sm:$0xff] %vm480_vm3, %v738_v24  ;;  %744 = vst.msk [vmem:[%s1850_s17 + $0xc0] sm:$0xff] %vm480_vm3, %v739_v25  ;;  %v814_v37 = vmul.f32 %v1233_v9, %v808_v16  ;;  %v815_v38 = vmul.f32 %v1234_v17, %v808_v16  ;;  %v1248_v42 = vld [vmem:[%s1693_s19 + $0xd8] sm:$0xff]  ;;  %s2065_s9 = sld [smem:[#allocation26_spill]]  ;;  %s1449_s1 = scalar_lea.vmem %s1928_s0, 4096 }
 0x1d2   : > { %v1835_v21 = vmul.f32 %v917_v43, %v910_v14  ;;  %v913_v28 = vld [vmem:[%s912_s2] sm:$0xff]  ;;  %v816_v39 = vmul.f32 %v1235_v18, %v808_v16  ;;  %v817_v40 = vmul.f32 %v1236_v19, %v808_v16  ;;  %1225 = vst.msk [vmem:[%s1850_s17 + $0x8] sm:$0xff] %vm480_vm3, %v775_v30  ;;  %1226 = vst.msk [vmem:[%s1850_s17 + $0x48] sm:$0xff] %vm480_vm3, %v776_v31  ;;  %v1270_v60 = vld [vmem:[%s1693_s19 + $0x68] sm:$0xff]  ;;  %p1450_p12 = scmp.ne.s32.totalorder %s1928_s0, %s1449_s1  ;;  %s1532_s7 = smov [#allocation5]  }
 0x1d3   : > { %v949_v29 = vld [vmem:[%s948_s3] sm:$0xff]  ;;  %1227 = vst.msk [vmem:[%s1850_s17 + $0x88] sm:$0xff] %vm480_vm3, %v777_v32  ;;  %1228 = vst.msk [vmem:[%s1850_s17 + $0xc8] sm:$0xff] %vm480_vm3, %v778_v33  ;;  %v847_v46 = vadd.f32 %v846_v11, %v841_v10  ;;  %v886_v47 = vadd.f32 %v885_v20, %v880_v12  ;;  %v924_v51 = vmul.f32 %v922_v44, %v913_v28  ;;  %v1271_v61 = vld [vmem:[%s1693_s19 + $0xa8] sm:$0xff]  ;;  %s1453_s18 = sshll.u32 %s1532_s7, 4  ;;  %s1454_s18 = int_to_ptr.vmem [resolvable:$false] %s1453_s18 }
 0x1d4   : > { %v952_v34 = vld [vmem:[%s951_s8] sm:$0xff]  ;;  %v958_v52 = vmul.f32 %v956_v45, %v949_v29  ;;  %1237 = vst.msk [vmem:[%s1850_s17 + $0x10] sm:$0xff] %vm480_vm3, %v814_v37  ;;  %1238 = vst.msk [vmem:[%s1850_s17 + $0x50] sm:$0xff] %vm480_vm3, %v815_v38  ;;  %v1282_v3 = vld [vmem:[%s1693_s19 + $0x70] sm:$0xff]  ;;  %p1451_p0 = pnand %p1450_p12, %p1613_p9  ;;  %s1455_s22 = scalar_lea.vmem %s1454_s18, 8192 }
 0x1d5   : > { %v988_v35 = vld [vmem:[%s987_s11] sm:$0xff]  ;;  %1239 = vst.msk [vmem:[%s1850_s17 + $0x90] sm:$0xff] %vm480_vm3, %v816_v39  ;;  %1240 = vst.msk [vmem:[%s1850_s17 + $0xd0] sm:$0xff] %vm480_vm3, %v817_v40  ;;  %v963_v54 = vmul.f32 %v961_v53, %v952_v34  ;;  %v853_v45 = vmul.f32 %v1245_v26, %v847_v46  ;;  %v854_v56 = vmul.f32 %v1246_v27, %v847_v46  ;;  %v1283_v6 = vld [vmem:[%s1693_s19 + $0xb0] sm:$0xff]  ;;  %p1456_p2 = scmp.lt.s32.totalorder %s1928_s0, %s1454_s18  ;;  %p1457_p3 = scmp.lt.s32.totalorder %s1455_s22, %s1449_s1 }
 0x1d6   : > { %v991_v36 = vld [vmem:[%s990_s6] sm:$0xff]  ;;  %v997_v55 = vmul.f32 %v995_v0, %v988_v35  ;;  %v855_v57 = vmul.f32 %v1247_v41, %v847_v46  ;;  %v856_v58 = vmul.f32 %v1248_v42, %v847_v46  ;;  %v925_v4 = vadd.f32 %v924_v51, %v1835_v21  ;;  %v1293_v9 = vld [vmem:[%s1693_s19 + $0x38] sm:$0xff]  ;;  %p1452_p1 = pneg %p1451_p0 }
 0x1d7   : > { %v1257_v43 = vld [vmem:[%s1693_s19 + $0x20] sm:$0xff]  ;;  %v1002_v44 = vmul.f32 %v1000_v7, %v991_v36  ;;  %1249 = vst.msk [vmem:[%s1850_s17 + $0x18] sm:$0xff] %vm480_vm3, %v853_v45  ;;  %1250 = vst.msk [vmem:[%s1850_s17 + $0x58] sm:$0xff] %vm480_vm3, %v854_v56  ;;  %v964_v5 = vadd.f32 %v963_v54, %v958_v52  ;;  %v1284_v7 = vld [vmem:[%s1693_s19 + $0xf0] sm:$0xff]  ;;  %s1926_s13 = scalar_lea.hbm %s2065_s9, %s1308_s5  ;;  %p1458_p4 = por %p1457_p3, %p1456_p2 }
 0x1d8   : > { %v1258_v48 = vld [vmem:[%s1693_s19 + $0x60] sm:$0xff]  ;;  %v892_v62 = vmul.f32 %v1257_v43, %v886_v47  ;;  %1251 = vst.msk [vmem:[%s1850_s17 + $0x98] sm:$0xff] %vm480_vm3, %v855_v57  ;;  %1252 = vst.msk [vmem:[%s1850_s17 + $0xd8] sm:$0xff] %vm480_vm3, %v856_v58  ;;  %v1294_v10 = vld [vmem:[%s1693_s19 + $0x78] sm:$0xff]  ;;  %v931_v13 = vmul.f32 %v1269_v59, %v925_v4  ;;  %v932_v14 = vmul.f32 %v1270_v60, %v925_v4 }
 0x1d9   : > { %v1259_v49 = vld [vmem:[%s1693_s19 + $0xa0] sm:$0xff]  ;;  %v893_v53 = vmul.f32 %v1258_v48, %v886_v47  ;;  %v1003_v8 = vadd.f32 %v1002_v44, %v997_v55  ;;  %v1295_v11 = vld [vmem:[%s1693_s19 + $0xb8] sm:$0xff]  ;;  %v933_v15 = vmul.f32 %v1271_v61, %v925_v4  ;;  %v934_v16 = vmul.f32 %v1272_v1, %v925_v4  ;;  %p1459_p5 = pnand %p1458_p4, %p1452_p1 }
 0x1da   : > { %v1260_v50 = vld [vmem:[%s1693_s19 + $0xe0] sm:$0xff]  ;;  %v894_v63 = vmul.f32 %v1259_v49, %v886_v47  ;;  %1261 = vst.msk [vmem:[%s1850_s17 + $0x20] sm:$0xff] %vm480_vm3, %v892_v62  ;;  %v1296_v12 = vld [vmem:[%s1693_s19 + $0xf8] sm:$0xff]  ;;  %v970_v17 = vmul.f32 %v1281_v2, %v964_v5  ;;  %v971_v18 = vmul.f32 %v1282_v3, %v964_v5  ;;  %v972_v19 = vmul.f32 %v1283_v6, %v964_v5 }
 0x1db   : > { %v895_v0 = vmul.f32 %v1260_v50, %v886_v47  ;;  %1262 = vst.msk [vmem:[%s1850_s17 + $0x60] sm:$0xff] %vm480_vm3, %v893_v53  ;;  %v973_v20 = vmul.f32 %v1284_v7, %v964_v5  ;;  %1273 = vst.msk [vmem:[%s1850_s17 + $0x28] sm:$0xff] %vm480_vm3, %v931_v13  ;;  %v1009_v21 = vmul.f32 %v1293_v9, %v1003_v8 }
 0x1dc   : > { %1263 = vst.msk [vmem:[%s1850_s17 + $0xa0] sm:$0xff] %vm480_vm3, %v894_v63  ;;  %1274 = vst.msk [vmem:[%s1850_s17 + $0x68] sm:$0xff] %vm480_vm3, %v932_v14  ;;  %v1010_v22 = vmul.f32 %v1294_v10, %v1003_v8  ;;  %v1011_v23 = vmul.f32 %v1295_v11, %v1003_v8  ;;  %v1012_v24 = vmul.f32 %v1296_v12, %v1003_v8 }
 0x1dd   : > { %1264 = vst.msk [vmem:[%s1850_s17 + $0xe0] sm:$0xff] %vm480_vm3, %v895_v0  ;;  %1275 = vst.msk [vmem:[%s1850_s17 + $0xa8] sm:$0xff] %vm480_vm3, %v933_v15 }
 0x1de   : > { %1276 = vst.msk [vmem:[%s1850_s17 + $0xe8] sm:$0xff] %vm480_vm3, %v934_v16  ;;  %1285 = vst.msk [vmem:[%s1850_s17 + $0x30] sm:$0xff] %vm480_vm3, %v970_v17 }
 0x1df   : > { %1286 = vst.msk [vmem:[%s1850_s17 + $0x70] sm:$0xff] %vm480_vm3, %v971_v18  ;;  %1287 = vst.msk [vmem:[%s1850_s17 + $0xb0] sm:$0xff] %vm480_vm3, %v972_v19 }
 0x1e0   : > { %1288 = vst.msk [vmem:[%s1850_s17 + $0xf0] sm:$0xff] %vm480_vm3, %v973_v20  ;;  %1297 = vst.msk [vmem:[%s1850_s17 + $0x38] sm:$0xff] %vm480_vm3, %v1009_v21 }
 0x1e1   : > { %1298 = vst.msk [vmem:[%s1850_s17 + $0x78] sm:$0xff] %vm480_vm3, %v1010_v22  ;;  %1299 = vst.msk [vmem:[%s1850_s17 + $0xb8] sm:$0xff] %vm480_vm3, %v1011_v23 }
 0x1e2   : > { %1300 = vst.msk [vmem:[%s1850_s17 + $0xf8] sm:$0xff] %vm480_vm3, %v1012_v24 }
 0x1e3   : > { %1462 = shalt.err (!%p1459_p5)
}
 0x1e4   : > { %s1463_s21 = scalar_lea.hbm %s1926_s13, 4096  ;;  %s1467_s26 = scalar_lea.hbm %s2065_s9, 8192 }
 0x1e5   : > { %p1464_p6 = scmp.ne.s32.totalorder %s1926_s13, %s1463_s21  ;;  %p1468_p10 = scmp.lt.s32.totalorder %s1926_s13, %s2065_s9 }
 0x1e6   : > { %p1469_p11 = scmp.lt.s32.totalorder %s1467_s26, %s1463_s21 }
 0x1e7   : > { %p1465_p7 = pnand %p1464_p6, %p1613_p9 }
 0x1e8   : > { %p1470_p12 = por %p1469_p11, %p1468_p10 }
 0x1e9   : > { %p1466_p8 = pneg %p1465_p7 }
 0x1eb   : > { %p1471_p0 = pnand %p1470_p12, %p1466_p8 }
 0x1ed   : > { %1474 = shalt.err (!%p1471_p0)
}
 0x1ee   : > { %s1533_s14 = smov 128   ;;  %s1534_s10 = smov 8  }
 0x1ef   : > { %1377 = dma.vmem_to_hbm [thread:$0]  (%p1613_p9), %s1928_s0, 4096, %s1926_s13, %s1956_s23, %s1533_s14, %s1533_s14, %s1534_s10  }
 0x1f0 PF: > { %s2068_s2 = sld [smem:[#allocation13_spill]] }
 0x1f1   : > { %s2069_s3 = sld [smem:[#allocation9_spill]] }
 0x1f6   : > { %p1383_p1 = scmp.ge.s32.totalorder %s2068_s2, 2 }
 0x1f7   : > { %s1052_s30 = sand.u32 1, %s2069_s3  }
 0x1f8   : > { %p1380_p2 = pnand %p1383_p1, %p1620_p13  ;;  %s1053_s11 = scalar_lea.sflag [#allocation6], %s1052_s30 }
 0x1fa   : > { %p1381_p3 = pneg %p1380_p2 }
 0x1fc   : > { %1502 = dma.done.wait (%p1381_p3), %s1053_s11, 4096  }
 0x1fd   : > { %1504 = vsyncadd (%p1381_p3), %s1053_s11, 4294963200  ;;  %s25_s30 = sadd.s32 1, %s2068_s2   ;;  %s2071_s12 = sld [smem:[#allocation10_spill]] }
 0x1fe   : > { %p22_p4 = scmp.ge.s32.totalorder %s25_s30, 4   ;;  %s2072_s0 = sld [smem:[#allocation17_spill]] }
 0x1ff   : > { %s2073_s28 = sld [smem:[#allocation12_spill]]  ;;  %s2075_s26 = smov %s1511_s27 }
 0x200   : > { %s2074_s29 = sld [smem:[#allocation14_spill]]  ;;  %24 = sbr.rel (!%p22_p4) target bundleno = 21 (0x15), region = 123 }
 0x203   : > { %s2076_s27 = smov %s2071_s12 }
 0x205   :  { %1058 = vsyncpa [#allocation6], 1 }
 0x206   :  { %1060 = vsyncpa [#allocation6 + $0x1], 1 }

</bundles_post_ra>
